<compile_context>
chip_gen: v5e
topology: v5e:2x2
jax: 0.10.0
libtpu: 0.0.40
codegen_flags: <defaults>
</compile_context>

<pallas_src>
import functools

import jax
import jax.numpy as jnp
from jax import lax
from jax.experimental import pallas as pl
from jax.experimental.pallas import tpu as pltpu


# ------------------------------ small helpers -------------------------------

def _cdiv(a, b):
    return -(-a // b)


def _round_up(x, m):
    return _cdiv(x, m) * m


def _pad_axis(a, axis, target):
    if a.shape[axis] == target:
        return a
    widths = [(0, 0)] * a.ndim
    widths[axis] = (0, target - a.shape[axis])
    return jnp.pad(a, widths)


def _to_bf16(a):
    return a if a.dtype == jnp.bfloat16 else a.astype(jnp.bfloat16)


_VMEM_LIMIT_CACHE = [None]


def _vmem_limit():
    """Per-generation VMEM limit (bytes): 0.75x physical capacity."""
    if _VMEM_LIMIT_CACHE[0] is None:
        try:
            cap = int(pltpu.get_tpu_info().vmem_capacity_bytes)
            limit = max(32 * 1024 * 1024, int(cap * 0.75))
        except Exception:
            # Fallback: value known to compile on this sandbox.
            limit = 64 * 1024 * 1024
        _VMEM_LIMIT_CACHE[0] = limit
    return _VMEM_LIMIT_CACHE[0]


def _choose_tn(cp):
    """Output-column tile: full width up to 512, else largest 128-mult tile."""
    if cp <= 512:
        return cp
    for t in (512, 256, 128):
        if cp % t == 0:
            return t
    return cp


def _choose_tm(m, k, tn, extra_row_bytes, out_bytes, budget, tm_cap):
    """Row tile: as large as the VMEM budget allows, balanced over the grid."""
    per_row = 2 * k * 2 + 2 * tn * out_bytes + extra_row_bytes   # dbl-buffered
    fixed = 2 * (k * tn * 2 + tn * 4)                            # weight + bias
    avail = max(budget - fixed, 16 * per_row)
    tm_mem = avail // max(per_row, 1)
    tm_acc = max(128, (2 * 1024 * 1024) // (4 * tn))   # keep f32 acc tile modest
    tm_max = int(max(16, min(tm_cap, tm_mem, tm_acc)))
    tm_max = max(16, (tm_max // 16) * 16)
    n = max(1, _cdiv(m, tm_max))
    if n == 1 and m >= 512:
        n = 2                       # keep >=2 row steps to feed both v7x cores
    tm = max(16, _round_up(_cdiv(m, n), 16))
    n = max(1, _cdiv(m, tm))
    return tm, n


# ----------------------------- Pallas kernels ------------------------------

def _mm_bias_kernel(x_ref, w_ref, b_ref, o_ref, *, apply_relu):
    """out = x @ w + bias, optional ReLU.  (BN scale pre-folded into w.)"""
    acc = jnp.dot(x_ref[...], w_ref[...], preferred_element_type=jnp.float32)
    acc = acc + b_ref[...]
    if apply_relu:
        acc = jnp.maximum(acc, 0.0)
    o_ref[...] = acc.astype(o_ref.dtype)


def _mm_bias_res_relu_kernel(x_ref, w_ref, b_ref, r_ref, o_ref):
    """out = relu(x @ w + bias + residual)   (identity shortcut, bf16 residual)."""
    acc = jnp.dot(x_ref[...], w_ref[...], preferred_element_type=jnp.float32)
    acc = acc + b_ref[...] + r_ref[...].astype(jnp.float32)
    o_ref[...] = jnp.maximum(acc, 0.0).astype(o_ref.dtype)


def _mm_bias_proj_res_relu_kernel(x_ref, w_ref, b_ref, r_ref, ws_ref, bs_ref,
                                  o_ref):
    """out = relu(x @ w + b + (x_sc @ w_sc + b_sc))  (projection shortcut).

    Both MXU matmuls are issued before the VPU epilogue so the second matmul
    overlaps the first one's epilogue."""
    acc = jnp.dot(x_ref[...], w_ref[...], preferred_element_type=jnp.float32)
    sc = jnp.dot(r_ref[...], ws_ref[...], preferred_element_type=jnp.float32)
    out = acc + sc + (b_ref[...] + bs_ref[...])
    o_ref[...] = jnp.maximum(out, 0.0).astype(o_ref.dtype)


def _conv3x3_bn_relu_kernel(x_ref, w_ref, b_ref, o_ref, *, stride, ho, wo):
    """3x3 conv (stride s) + folded BN + ReLU as 9 accumulated matmuls.

    x_ref : (s*s, Hq, Wq, Kin)  phase-decomposed, spatially padded input image
    w_ref : (9, Kin, Cp)        per-tap weight matrices, BN scale folded
    b_ref : (1, Cp)             folded BN bias
    o_ref : (1, ho*wo, Cp)
    """
    s = stride
    kin = x_ref.shape[-1]
    cp = w_ref.shape[-1]
    acc = jnp.zeros((ho * wo, cp), jnp.float32)
    for dy in range(3):
        for dx in range(3):
            p = (dy % s) * s + (dx % s)
            win = x_ref[p, dy // s: dy // s + ho, dx // s: dx // s + wo, :]
            acc = acc + jnp.dot(win.reshape(ho * wo, kin),
                                w_ref[dy * 3 + dx],
                                preferred_element_type=jnp.float32)
    out = jnp.maximum(acc + b_ref[...], 0.0)
    o_ref[0] = out.astype(o_ref.dtype)


# ------------------------------ call wrappers --------------------------------

def fused_matmul_bn(x_rows, w_mat, bias, *, relu=True, out_dtype=jnp.float32,
                    res_rows=None, w_sc=None, bias_sc=None, tm_cap=2048):
    """Fused (conv-as-matmul)+BN(+residual)(+ReLU) via one pallas_call.

    x_rows  [M, K]      : output-pixel rows (cast to bf16 here if needed)
    w_mat   [K, Cout]   : weight with BN scale already folded in (f32)
    bias    [Cout]      : folded BN bias
    Returns [M, Cp] with Cp = round_up(Cout, 128); padded columns are zero.
    """
    M, K = x_rows.shape
    Cout = w_mat.shape[1]
    Cp = _round_up(Cout, 128)              # lane-dense output (unmasked vst)
    tn = _choose_tn(Cp)
    out_bytes = jnp.dtype(out_dtype).itemsize
    vlim = _vmem_limit()

    extra_row, extra_fixed = 0, 0
    if res_rows is not None:
        if w_sc is None:
            extra_row = 2 * tn * 2                     # bf16 residual tile
        else:
            Kr = res_rows.shape[1]
            extra_row = 2 * Kr * 2
            extra_fixed = 2 * (Kr * tn * 2 + tn * 4)

    tm, n_row = _choose_tm(M, K, tn, extra_row, out_bytes,
                           int(vlim * 0.6) - extra_fixed, tm_cap)
    Mp = n_row * tm

    xb = _pad_axis(_to_bf16(x_rows), 0, Mp)
    wb = _to_bf16(_pad_axis(w_mat, 1, Cp))
    bb = _pad_axis(bias.reshape(1, Cout).astype(jnp.float32), 1, Cp)

    in_specs = [
        pl.BlockSpec((tm, K), lambda i, j: (i, 0)),    # row tile
        pl.BlockSpec((K, tn), lambda i, j: (0, j)),    # (scale-folded) weight
        pl.BlockSpec((1, tn), lambda i, j: (0, j)),    # folded BN bias
    ]
    args = [xb, wb, bb]
    flops = 2 * Mp * K * Cp
    bytes_acc = xb.size * 2 + wb.size * 2 + bb.size * 4 + Mp * Cp * out_bytes

    if res_rows is None:
        kernel = functools.partial(_mm_bias_kernel, apply_relu=relu)
    elif w_sc is None:
        # identity shortcut: bf16 residual stream added to the f32 accumulator
        rb = _pad_axis(_pad_axis(_to_bf16(res_rows), 0, Mp), 1, Cp)
        in_specs.append(pl.BlockSpec((tm, tn), lambda i, j: (i, j)))
        args.append(rb)
        kernel = _mm_bias_res_relu_kernel
        bytes_acc += rb.size * 2
    else:
        # projection shortcut fused in (second small matmul on the same rows)
        Kr = res_rows.shape[1]
        rb = _pad_axis(_to_bf16(res_rows), 0, Mp)
        wsb = _to_bf16(_pad_axis(w_sc, 1, Cp))
        bsb = _pad_axis(bias_sc.reshape(1, -1).astype(jnp.float32), 1, Cp)
        in_specs += [pl.BlockSpec((tm, Kr), lambda i, j: (i, 0)),
                     pl.BlockSpec((Kr, tn), lambda i, j: (0, j)),
                     pl.BlockSpec((1, tn), lambda i, j: (0, j))]
        args += [rb, wsb, bsb]
        kernel = _mm_bias_proj_res_relu_kernel
        flops += 2 * Mp * Kr * Cp
        bytes_acc += rb.size * 2 + wsb.size * 2 + bsb.size * 4

    out = pl.pallas_call(
        kernel,
        out_shape=jax.ShapeDtypeStruct((Mp, Cp), out_dtype),
        grid=(n_row, Cp // tn),
        in_specs=in_specs,
        out_specs=pl.BlockSpec((tm, tn), lambda i, j: (i, j)),
        compiler_params=pltpu.CompilerParams(
            dimension_semantics=("parallel", "parallel"),
            vmem_limit_bytes=int(vlim)),
        cost_estimate=pl.CostEstimate(flops=int(flops), transcendentals=0,
                                      bytes_accessed=int(bytes_acc)),
    )(*args)
    return out[:M]            # rows are exact in the common case; cols stay padded


def im2col(x_nhwc, ksize, stride, padding):
    """Fallback-only patch extraction: ([N*Ho*Wo, k*k*C], (N, Ho, Wo))."""
    N, H, W, C = x_nhwc.shape
    xp = jnp.pad(x_nhwc, ((0, 0), (padding, padding), (padding, padding), (0, 0)))
    Ho = (H + 2 * padding - ksize) // stride + 1
    Wo = (W + 2 * padding - ksize) // stride + 1
    cols = []
    for dy in range(ksize):
        for dx in range(ksize):
            cols.append(xp[:, dy:dy + stride * Ho:stride,
                           dx:dx + stride * Wo:stride, :])
    patches = jnp.concatenate(cols, axis=-1)
    return patches.reshape(N * Ho * Wo, ksize * ksize * C), (N, Ho, Wo)


def bn_fold(gamma, beta, mean, var, eps=1e-5):
    scale = gamma / jnp.sqrt(var + eps)
    bias = beta - mean * scale
    return scale, bias


def conv_weight_to_matrix(w_oihw):
    """[Cout, Cin, kh, kw] -> [kh*kw*Cin, Cout], tap-major row order."""
    Cout, Cin, kh, kw = w_oihw.shape
    return jnp.transpose(w_oihw, (2, 3, 1, 0)).reshape(kh * kw * Cin, Cout)


def conv3x3_bn_relu(h1_nhwc, w_oihw, gamma, beta, mean, var, *, stride,
                    out_dtype=jnp.bfloat16):
    """3x3 conv + BN + ReLU without materializing im2col patches in HBM.

    h1_nhwc may carry zero-padded channels (Kin >= w_oihw.shape[1]).
    Returns ([N*Ho*Wo, Cp], Ho, Wo) with Cp = round_up(Cout, 128).
    """
    N, H, W, Kin = h1_nhwc.shape
    Cout, Cin_w = w_oihw.shape[0], w_oihw.shape[1]
    s = stride
    Ho = (H + 2 - 3) // s + 1
    Wo = (W + 2 - 3) // s + 1
    Cp = _round_up(Cout, 128)
    out_bytes = jnp.dtype(out_dtype).itemsize
    vlim = _vmem_limit()

    scale, bias = bn_fold(gamma, beta, mean, var)

    Hq, Wq = _cdiv(H + 2, s), _cdiv(W + 2, s)
    est = (2 * (s * s * Hq * Wq * Kin * 2) + 2 * (9 * Kin * Cp * 2)
           + 2 * (Ho * Wo * Cp * out_bytes) + Ho * Wo * Cp * 4 + 2 * Cp * 4)
    if Wo % 8 != 0 or est > int(vlim * 0.7):
        # Fallback: HBM im2col + matmul (only for shapes the in-kernel path
        # cannot tile; 9x patch inflation).
        wm = conv_weight_to_matrix(w_oihw) * scale[None, :]
        patches, _ = im2col(h1_nhwc[..., :Cin_w], 3, s, 1)
        out = fused_matmul_bn(patches, wm, bias, relu=True,
                              out_dtype=out_dtype, tm_cap=1024)
        return out, Ho, Wo

    # Per-tap weight matrices (9, Kin, Cp), BN scale folded, zero-padded.
    w = jnp.transpose(w_oihw, (2, 3, 1, 0)).reshape(9, Cin_w, Cout)
    w = w * scale[None, None, :]
    w = _to_bf16(_pad_axis(_pad_axis(w, 1, Kin), 2, Cp))
    b = _pad_axis(bias.reshape(1, Cout).astype(jnp.float32), 1, Cp)

    # Phase (space-to-batch) decomposition so every tap window is a
    # contiguous in-kernel slice, for stride 1 and 2 alike.
    Hs, Ws = Hq * s, Wq * s
    xpad = jnp.pad(_to_bf16(h1_nhwc),
                   ((0, 0), (1, Hs - H - 1), (1, Ws - W - 1), (0, 0)))
    x_ph = xpad.reshape(N, Hq, s, Wq, s, Kin)
    x_ph = jnp.transpose(x_ph, (0, 2, 4, 1, 3, 5)).reshape(N * s * s, Hq, Wq, Kin)

    out = pl.pallas_call(
        functools.partial(_conv3x3_bn_relu_kernel, stride=s, ho=Ho, wo=Wo),
        out_shape=jax.ShapeDtypeStruct((N, Ho * Wo, Cp), out_dtype),
        grid=(N,),
        in_specs=[
            pl.BlockSpec((s * s, Hq, Wq, Kin), lambda n: (n, 0, 0, 0)),
            pl.BlockSpec((9, Kin, Cp), lambda n: (0, 0, 0)),
            pl.BlockSpec((1, Cp), lambda n: (0, 0)),
        ],
        out_specs=pl.BlockSpec((1, Ho * Wo, Cp), lambda n: (n, 0, 0)),
        compiler_params=pltpu.CompilerParams(
            dimension_semantics=("parallel",),
            vmem_limit_bytes=int(vlim)),
        cost_estimate=pl.CostEstimate(
            flops=int(2 * 9 * N * Ho * Wo * Kin * Cp), transcendentals=0,
            bytes_accessed=int(x_ph.size * 2 + w.size * 2 + b.size * 4
                               + N * Ho * Wo * Cp * out_bytes)),
    )(x_ph, w, b)
    return out.reshape(N * Ho * Wo, Cp), Ho, Wo


# ------------------------------- JAX glue -----------------------------------

def bottleneck_forward(x_nchw, params, *, stride):
    """ResNet Bottleneck forward; input/output are NCHW (PyTorch convention)."""
    x = _to_bf16(jnp.transpose(x_nchw, (0, 2, 3, 1)))   # NHWC, single bf16 cast
    N, H, W, Cin = x.shape
    planes = params["w1"].shape[0]
    out_planes = params["w3"].shape[0]       # expansion * planes

    # conv1 (1x1) + bn1 + relu  -- pure matmul, bf16 output, padded channels
    s1, b1 = bn_fold(params["g1"], params["be1"], params["m1"], params["v1"])
    w1 = conv_weight_to_matrix(params["w1"]) * s1[None, :]
    h1 = fused_matmul_bn(x.reshape(N * H * W, Cin), w1, b1,
                         relu=True, out_dtype=jnp.bfloat16)
    Cp1 = h1.shape[1]
    h1 = h1.reshape(N, H, W, Cp1)            # zero-padded channels, stays bf16

    # conv2 (3x3, stride, pad 1) + bn2 + relu  -- in-kernel 9-tap accumulation
    h2, Ho, Wo = conv3x3_bn_relu(h1, params["w2"], params["g2"], params["be2"],
                                 params["m2"], params["v2"], stride=stride,
                                 out_dtype=jnp.bfloat16)
    M2 = N * Ho * Wo

    # conv3 (1x1) + bn3 + shortcut + residual add + relu -- single fused kernel
    s3, b3 = bn_fold(params["g3"], params["be3"], params["m3"], params["v3"])
    w3 = conv_weight_to_matrix(params["w3"]) * s3[None, :]
    w3 = _pad_axis(w3, 0, h2.shape[1])       # match channel-padded h2 (zero rows)
    if stride != 1 or Cin != out_planes:
        # projection shortcut: 1x1 stride-s conv == strided spatial subsample
        xs = x[:, ::stride, ::stride, :][:, :Ho, :Wo, :].reshape(M2, Cin)
        ss, bs = bn_fold(params["gs"], params["bes"], params["ms"], params["vs"])
        ws = conv_weight_to_matrix(params["ws"]) * ss[None, :]
        out = fused_matmul_bn(h2, w3, b3, relu=True, out_dtype=jnp.float32,
                              res_rows=xs, w_sc=ws, bias_sc=bs)
    else:
        out = fused_matmul_bn(h2, w3, b3, relu=True, out_dtype=jnp.float32,
                              res_rows=x.reshape(N * H * W, Cin))

    out = out[:, :out_planes].reshape(N, Ho, Wo, out_planes)
    return jnp.transpose(out, (0, 3, 1, 2)).astype(x_nchw.dtype)  # NCHW


# --------------------------- pure-JAX reference ------------------------------

def reference_block(x, p, stride, eps=1e-5):
    prec = lax.Precision.HIGHEST

    def conv(x, w, s, pad):
        return lax.conv_general_dilated(
            x, w, (s, s), ((pad, pad), (pad, pad)),
            dimension_numbers=("NCHW", "OIHW", "NCHW"), precision=prec)

    def bn(x, g, b, m, v):
        sc = (g / jnp.sqrt(v + eps))[None, :, None, None]
        return (x - m[None, :, None, None]) * sc + b[None, :, None, None]

    out = jax.nn.relu(bn(conv(x, p["w1"], 1, 0),
                         p["g1"], p["be1"], p["m1"], p["v1"]))
    out = jax.nn.relu(bn(conv(out, p["w2"], stride, 1),
                         p["g2"], p["be2"], p["m2"], p["v2"]))
    out = bn(conv(out, p["w3"], 1, 0), p["g3"], p["be3"], p["m3"], p["v3"])
    if stride != 1 or x.shape[1] != p["w3"].shape[0]:
        sc = bn(conv(x, p["ws"], stride, 0),
                p["gs"], p["bes"], p["ms"], p["vs"])
    else:
        sc = x
    return jax.nn.relu(out + sc)


# --------------------------------- main --------------------------------------

if __name__ == "__main__":
    key = jax.random.PRNGKey(0)
    N, Cin, H, W = 2, 16, 16, 16
    planes, stride = 16, 2                 # projection shortcut path
    out_planes = 4 * planes                # Bottleneck expansion = 4

    ks = list(jax.random.split(key, 24))
    f32 = jnp.float32
    params = {
        # conv1 1x1 / bn1
        "w1": jax.random.normal(ks[0], (planes, Cin, 1, 1), f32) * 0.1,
        "g1": jax.random.uniform(ks[1], (planes,), f32, 0.5, 1.5),
        "be1": jax.random.normal(ks[2], (planes,), f32) * 0.1,
        "m1": jax.random.normal(ks[3], (planes,), f32) * 0.1,
        "v1": jax.random.uniform(ks[4], (planes,), f32, 0.5, 1.5),
        # conv2 3x3 / bn2
        "w2": jax.random.normal(ks[5], (planes, planes, 3, 3), f32) * 0.1,
        "g2": jax.random.uniform(ks[6], (planes,), f32, 0.5, 1.5),
        "be2": jax.random.normal(ks[7], (planes,), f32) * 0.1,
        "m2": jax.random.normal(ks[8], (planes,), f32) * 0.1,
        "v2": jax.random.uniform(ks[9], (planes,), f32, 0.5, 1.5),
        # conv3 1x1 / bn3
        "w3": jax.random.normal(ks[10], (out_planes, planes, 1, 1), f32) * 0.1,
        "g3": jax.random.uniform(ks[11], (out_planes,), f32, 0.5, 1.5),
        "be3": jax.random.normal(ks[12], (out_planes,), f32) * 0.1,
        "m3": jax.random.normal(ks[13], (out_planes,), f32) * 0.1,
        "v3": jax.random.uniform(ks[14], (out_planes,), f32, 0.5, 1.5),
        # shortcut 1x1 conv / bn
        "ws": jax.random.normal(ks[15], (out_planes, Cin, 1, 1), f32) * 0.1,
        "gs": jax.random.uniform(ks[16], (out_planes,), f32, 0.5, 1.5),
        "bes": jax.random.normal(ks[17], (out_planes,), f32) * 0.1,
        "ms": jax.random.normal(ks[18], (out_planes,), f32) * 0.1,
        "vs": jax.random.uniform(ks[19], (out_planes,), f32, 0.5, 1.5),
    }
    x = jax.random.normal(ks[20], (N, Cin, H, W), f32)

    fwd = jax.jit(functools.partial(bottleneck_forward, stride=stride))
    out = jax.block_until_ready(fwd(x, params))
    assert out.shape == (N, out_planes, H // stride, W // stride), out.shape

    ref = jax.block_until_ready(reference_block(x, params, stride))
    # Tolerance note: all matmul inputs and intermediate activations are bf16
    # (f32 accumulation); chained over three convs this gives ~1e-2 relative
    # error vs the HIGHEST-precision f32 reference, so compare at 5e-2.
    if not jnp.allclose(out, ref, atol=5e-2, rtol=5e-2):
        err = float(jnp.max(jnp.abs(out - ref)))
        raise AssertionError(f"Pallas Bottleneck mismatch vs reference "
                             f"(max abs err {err:.4f})")

    print("KERNEL_OK")
</pallas_src>

<mosaic_0001>
module attributes {stable_mosaic.version = 11 : i64} {
  func.func @_mm_bias_kernel(%arg0: i32, %arg1: i32, %arg2: memref<256x16xbf16, #tpu.memory_space<vmem>>, %arg3: memref<16x128xbf16, #tpu.memory_space<vmem>>, %arg4: memref<1x128xf32, #tpu.memory_space<vmem>>, %arg5: memref<256x128xbf16, #tpu.memory_space<vmem>>) attributes {dimension_semantics = [#tpu.dimension_semantics<parallel>, #tpu.dimension_semantics<parallel>], iteration_bounds = array<i64: 2, 1>, scalar_prefetch = 0 : i64, scratch_operands = 0 : i64, tpu.core_type = #tpu.core_type<tc>, window_params = [{transform_indices = @transform_0, window_bounds = array<i64: 256, 16>}, {transform_indices = @transform_1, window_bounds = array<i64: 16, 128>}, {transform_indices = @transform_2, window_bounds = array<i64: 1, 128>}, {transform_indices = @transform_3, window_bounds = array<i64: 256, 128>}]} {
    %c0 = arith.constant 0 : index
    %c0_0 = arith.constant 0 : index
    %0 = vector.load %arg2[%c0, %c0_0] : memref<256x16xbf16, #tpu.memory_space<vmem>>, vector<256x16xbf16>
    %c0_1 = arith.constant 0 : index
    %c0_2 = arith.constant 0 : index
    %1 = vector.load %arg3[%c0_1, %c0_2] : memref<16x128xbf16, #tpu.memory_space<vmem>>, vector<16x128xbf16>
    %cst = arith.constant dense<0.000000e+00> : vector<256x128xf32>
    %2 = tpu.matmul %0, %1, %cst {dimension_numbers = #tpu.dot_dimension_numbers<[1], [0], [0], [1], [0, 0, 1, 1], [], []>} : vector<256x16xbf16>, vector<16x128xbf16>, vector<256x128xf32> -> vector<256x128xf32>
    %c0_3 = arith.constant 0 : index
    %c0_4 = arith.constant 0 : index
    %3 = vector.load %arg4[%c0_3, %c0_4] : memref<1x128xf32, #tpu.memory_space<vmem>>, vector<1x128xf32>
    %4 = vector.broadcast %3 : vector<1x128xf32> to vector<256x128xf32>
    %5 = arith.addf %2, %4 : vector<256x128xf32>
    %cst_5 = arith.constant 0.000000e+00 : f32
    %6 = vector.broadcast %cst_5 : f32 to vector<256x128xf32>
    %7 = arith.maximumf %5, %6 : vector<256x128xf32>
    %8 = arith.truncf %7 : vector<256x128xf32> to vector<256x128xbf16>
    %c0_6 = arith.constant 0 : index
    %c0_7 = arith.constant 0 : index
    %9 = vector.load %arg5[%c0_6, %c0_7] : memref<256x128xbf16, #tpu.memory_space<vmem>>, vector<256x128xbf16>
    tpu.vector_store %arg5[%c0_6, %c0_7], %8 {strides = array<i32>} : memref<256x128xbf16, #tpu.memory_space<vmem>>, vector<256x128xbf16>,
    return
  }
  func.func @transform_0(%arg0: i32, %arg1: i32) -> (i32, i32) {
    %c0_i32 = arith.constant 0 : i32
    %c0_i32_0 = arith.constant 0 : i32
    return %arg0, %c0_i32 : i32, i32
  }
  func.func @transform_1(%arg0: i32, %arg1: i32) -> (i32, i32) {
    %c0_i32 = arith.constant 0 : i32
    %c0_i32_0 = arith.constant 0 : i32
    return %c0_i32, %arg1 : i32, i32
  }
  func.func @transform_2(%arg0: i32, %arg1: i32) -> (i32, i32) {
    %c0_i32 = arith.constant 0 : i32
    %c0_i32_0 = arith.constant 0 : i32
    return %c0_i32, %arg1 : i32, i32
  }
  func.func @transform_3(%arg0: i32, %arg1: i32) -> (i32, i32) {
    %c0_i32 = arith.constant 0 : i32
    return %arg0, %arg1 : i32, i32
  }
}

module attributes {stable_mosaic.version = 11 : i64} {
  func.func @_conv3x3_bn_relu_kernel(%arg0: i32, %arg1: memref<4x9x9x128xbf16, #tpu.memory_space<vmem>>, %arg2: memref<9x128x128xbf16, #tpu.memory_space<vmem>>, %arg3: memref<1x128xf32, #tpu.memory_space<vmem>>, %arg4: memref<1x64x128xbf16, #tpu.memory_space<vmem>>) attributes {dimension_semantics = [#tpu.dimension_semantics<parallel>], iteration_bounds = array<i64: 2>, scalar_prefetch = 0 : i64, scratch_operands = 0 : i64, tpu.core_type = #tpu.core_type<tc>, window_params = [{transform_indices = @transform_0, window_bounds = array<i64: 4, 9, 9, 128>}, {pipeline_mode = #tpu.pipeline_mode<synchronous>, transform_indices = @transform_1, window_bounds = array<i64: 9, 128, 128>}, {pipeline_mode = #tpu.pipeline_mode<synchronous>, transform_indices = @transform_2, window_bounds = array<i64: 1, 128>}, {transform_indices = @transform_3, window_bounds = array<i64: 1, 64, 128>}]} {
    %cst = arith.constant 0.000000e+00 : f32
    %0 = vector.broadcast %cst : f32 to vector<64x128xf32>
    %c0 = arith.constant 0 : index
    %c0_0 = arith.constant 0 : index
    %c0_1 = arith.constant 0 : index
    %c0_2 = arith.constant 0 : index
    %1 = vector.load %arg1[%c0, %c0_0, %c0_1, %c0_2] : memref<4x9x9x128xbf16, #tpu.memory_space<vmem>>, vector<1x8x8x128xbf16>
    %2 = vector.shape_cast %1 : vector<1x8x8x128xbf16> to vector<8x8x128xbf16>
    %3 = vector.shape_cast %2 : vector<8x8x128xbf16> to vector<64x128xbf16>
    %c0_3 = arith.constant 0 : index
    %c0_4 = arith.constant 0 : index
    %c0_5 = arith.constant 0 : index
    %4 = vector.load %arg2[%c0_3, %c0_4, %c0_5] : memref<9x128x128xbf16, #tpu.memory_space<vmem>>, vector<1x128x128xbf16>
    %5 = vector.shape_cast %4 : vector<1x128x128xbf16> to vector<128x128xbf16>
    %cst_6 = arith.constant dense<0.000000e+00> : vector<64x128xf32>
    %6 = tpu.matmul %3, %5, %cst_6 {dimension_numbers = #tpu.dot_dimension_numbers<[1], [0], [0], [1], [0, 0, 1, 1], [], []>} : vector<64x128xbf16>, vector<128x128xbf16>, vector<64x128xf32> -> vector<64x128xf32>
    %7 = arith.addf %0, %6 : vector<64x128xf32>
    %c1 = arith.constant 1 : index
    %c0_7 = arith.constant 0 : index
    %c0_8 = arith.constant 0 : index
    %c0_9 = arith.constant 0 : index
    %8 = vector.load %arg1[%c1, %c0_7, %c0_8, %c0_9] : memref<4x9x9x128xbf16, #tpu.memory_space<vmem>>, vector<1x8x8x128xbf16>
    %9 = vector.shape_cast %8 : vector<1x8x8x128xbf16> to vector<8x8x128xbf16>
    %10 = vector.shape_cast %9 : vector<8x8x128xbf16> to vector<64x128xbf16>
    %c1_10 = arith.constant 1 : index
    %c0_11 = arith.constant 0 : index
    %c0_12 = arith.constant 0 : index
    %11 = vector.load %arg2[%c1_10, %c0_11, %c0_12] : memref<9x128x128xbf16, #tpu.memory_space<vmem>>, vector<1x128x128xbf16>
    %12 = vector.shape_cast %11 : vector<1x128x128xbf16> to vector<128x128xbf16>
    %cst_13 = arith.constant dense<0.000000e+00> : vector<64x128xf32>
    %13 = tpu.matmul %10, %12, %cst_13 {dimension_numbers = #tpu.dot_dimension_numbers<[1], [0], [0], [1], [0, 0, 1, 1], [], []>} : vector<64x128xbf16>, vector<128x128xbf16>, vector<64x128xf32> -> vector<64x128xf32>
    %14 = arith.addf %7, %13 : vector<64x128xf32>
    %c0_14 = arith.constant 0 : index
    %c0_15 = arith.constant 0 : index
    %c1_16 = arith.constant 1 : index
    %c0_17 = arith.constant 0 : index
    %15 = vector.load %arg1[%c0_14, %c0_15, %c1_16, %c0_17] : memref<4x9x9x128xbf16, #tpu.memory_space<vmem>>, vector<1x8x8x128xbf16>
    %16 = vector.shape_cast %15 : vector<1x8x8x128xbf16> to vector<8x8x128xbf16>
    %17 = vector.shape_cast %16 : vector<8x8x128xbf16> to vector<64x128xbf16>
    %c2 = arith.constant 2 : index
    %c0_18 = arith.constant 0 : index
    %c0_19 = arith.constant 0 : index
    %18 = vector.load %arg2[%c2, %c0_18, %c0_19] : memref<9x128x128xbf16, #tpu.memory_space<vmem>>, vector<1x128x128xbf16>
    %19 = vector.shape_cast %18 : vector<1x128x128xbf16> to vector<128x128xbf16>
    %cst_20 = arith.constant dense<0.000000e+00> : vector<64x128xf32>
    %20 = tpu.matmul %17, %19, %cst_20 {dimension_numbers = #tpu.dot_dimension_numbers<[1], [0], [0], [1], [0, 0, 1, 1], [], []>} : vector<64x128xbf16>, vector<128x128xbf16>, vector<64x128xf32> -> vector<64x128xf32>
    %21 = arith.addf %14, %20 : vector<64x128xf32>
    %c2_21 = arith.constant 2 : index
    %c0_22 = arith.constant 0 : index
    %c0_23 = arith.constant 0 : index
    %c0_24 = arith.constant 0 : index
    %22 = vector.load %arg1[%c2_21, %c0_22, %c0_23, %c0_24] : memref<4x9x9x128xbf16, #tpu.memory_space<vmem>>, vector<1x8x8x128xbf16>
    %23 = vector.shape_cast %22 : vector<1x8x8x128xbf16> to vector<8x8x128xbf16>
    %24 = vector.shape_cast %23 : vector<8x8x128xbf16> to vector<64x128xbf16>
    %c3 = arith.constant 3 : index
    %c0_25 = arith.constant 0 : index
    %c0_26 = arith.constant 0 : index
    %25 = vector.load %arg2[%c3, %c0_25, %c0_26] : memref<9x128x128xbf16, #tpu.memory_space<vmem>>, vector<1x128x128xbf16>
    %26 = vector.shape_cast %25 : vector<1x128x128xbf16> to vector<128x128xbf16>
    %cst_27 = arith.constant dense<0.000000e+00> : vector<64x128xf32>
    %27 = tpu.matmul %24, %26, %cst_27 {dimension_numbers = #tpu.dot_dimension_numbers<[1], [0], [0], [1], [0, 0, 1, 1], [], []>} : vector<64x128xbf16>, vector<128x128xbf16>, vector<64x128xf32> -> vector<64x128xf32>
    %28 = arith.addf %21, %27 : vector<64x128xf32>
    %c3_28 = arith.constant 3 : index
    %c0_29 = arith.constant 0 : index
    %c0_30 = arith.constant 0 : index
    %c0_31 = arith.constant 0 : index
    %29 = vector.load %arg1[%c3_28, %c0_29, %c0_30, %c0_31] : memref<4x9x9x128xbf16, #tpu.memory_space<vmem>>, vector<1x8x8x128xbf16>
    %30 = vector.shape_cast %29 : vector<1x8x8x128xbf16> to vector<8x8x128xbf16>
    %31 = vector.shape_cast %30 : vector<8x8x128xbf16> to vector<64x128xbf16>
    %c4 = arith.constant 4 : index
    %c0_32 = arith.constant 0 : index
    %c0_33 = arith.constant 0 : index
    %32 = vector.load %arg2[%c4, %c0_32, %c0_33] : memref<9x128x128xbf16, #tpu.memory_space<vmem>>, vector<1x128x128xbf16>
    %33 = vector.shape_cast %32 : vector<1x128x128xbf16> to vector<128x128xbf16>
    %cst_34 = arith.constant dense<0.000000e+00> : vector<64x128xf32>
    %34 = tpu.matmul %31, %33, %cst_34 {dimension_numbers = #tpu.dot_dimension_numbers<[1], [0], [0], [1], [0, 0, 1, 1], [], []>} : vector<64x128xbf16>, vector<128x128xbf16>, vector<64x128xf32> -> vector<64x128xf32>
    %35 = arith.addf %28, %34 : vector<64x128xf32>
    %c2_35 = arith.constant 2 : index
    %c0_36 = arith.constant 0 : index
    %c1_37 = arith.constant 1 : index
    %c0_38 = arith.constant 0 : index
    %36 = vector.load %arg1[%c2_35, %c0_36, %c1_37, %c0_38] : memref<4x9x9x128xbf16, #tpu.memory_space<vmem>>, vector<1x8x8x128xbf16>
    %37 = vector.shape_cast %36 : vector<1x8x8x128xbf16> to vector<8x8x128xbf16>
    %38 = vector.shape_cast %37 : vector<8x8x128xbf16> to vector<64x128xbf16>
    %c5 = arith.constant 5 : index
    %c0_39 = arith.constant 0 : index
    %c0_40 = arith.constant 0 : index
    %39 = vector.load %arg2[%c5, %c0_39, %c0_40] : memref<9x128x128xbf16, #tpu.memory_space<vmem>>, vector<1x128x128xbf16>
    %40 = vector.shape_cast %39 : vector<1x128x128xbf16> to vector<128x128xbf16>
    %cst_41 = arith.constant dense<0.000000e+00> : vector<64x128xf32>
    %41 = tpu.matmul %38, %40, %cst_41 {dimension_numbers = #tpu.dot_dimension_numbers<[1], [0], [0], [1], [0, 0, 1, 1], [], []>} : vector<64x128xbf16>, vector<128x128xbf16>, vector<64x128xf32> -> vector<64x128xf32>
    %42 = arith.addf %35, %41 : vector<64x128xf32>
    %c0_42 = arith.constant 0 : index
    %c1_43 = arith.constant 1 : index
    %c0_44 = arith.constant 0 : index
    %c0_45 = arith.constant 0 : index
    %43 = vector.load %arg1[%c0_42, %c1_43, %c0_44, %c0_45] : memref<4x9x9x128xbf16, #tpu.memory_space<vmem>>, vector<1x8x8x128xbf16>
    %44 = vector.shape_cast %43 : vector<1x8x8x128xbf16> to vector<8x8x128xbf16>
    %45 = vector.shape_cast %44 : vector<8x8x128xbf16> to vector<64x128xbf16>
    %c6 = arith.constant 6 : index
    %c0_46 = arith.constant 0 : index
    %c0_47 = arith.constant 0 : index
    %46 = vector.load %arg2[%c6, %c0_46, %c0_47] : memref<9x128x128xbf16, #tpu.memory_space<vmem>>, vector<1x128x128xbf16>
    %47 = vector.shape_cast %46 : vector<1x128x128xbf16> to vector<128x128xbf16>
    %cst_48 = arith.constant dense<0.000000e+00> : vector<64x128xf32>
    %48 = tpu.matmul %45, %47, %cst_48 {dimension_numbers = #tpu.dot_dimension_numbers<[1], [0], [0], [1], [0, 0, 1, 1], [], []>} : vector<64x128xbf16>, vector<128x128xbf16>, vector<64x128xf32> -> vector<64x128xf32>
    %49 = arith.addf %42, %48 : vector<64x128xf32>
    %c1_49 = arith.constant 1 : index
    %c1_50 = arith.constant 1 : index
    %c0_51 = arith.constant 0 : index
    %c0_52 = arith.constant 0 : index
    %50 = vector.load %arg1[%c1_49, %c1_50, %c0_51, %c0_52] : memref<4x9x9x128xbf16, #tpu.memory_space<vmem>>, vector<1x8x8x128xbf16>
    %51 = vector.shape_cast %50 : vector<1x8x8x128xbf16> to vector<8x8x128xbf16>
    %52 = vector.shape_cast %51 : vector<8x8x128xbf16> to vector<64x128xbf16>
    %c7 = arith.constant 7 : index
    %c0_53 = arith.constant 0 : index
    %c0_54 = arith.constant 0 : index
    %53 = vector.load %arg2[%c7, %c0_53, %c0_54] : memref<9x128x128xbf16, #tpu.memory_space<vmem>>, vector<1x128x128xbf16>
    %54 = vector.shape_cast %53 : vector<1x128x128xbf16> to vector<128x128xbf16>
    %cst_55 = arith.constant dense<0.000000e+00> : vector<64x128xf32>
    %55 = tpu.matmul %52, %54, %cst_55 {dimension_numbers = #tpu.dot_dimension_numbers<[1], [0], [0], [1], [0, 0, 1, 1], [], []>} : vector<64x128xbf16>, vector<128x128xbf16>, vector<64x128xf32> -> vector<64x128xf32>
    %56 = arith.addf %49, %55 : vector<64x128xf32>
    %c0_56 = arith.constant 0 : index
    %c1_57 = arith.constant 1 : index
    %c1_58 = arith.constant 1 : index
    %c0_59 = arith.constant 0 : index
    %57 = vector.load %arg1[%c0_56, %c1_57, %c1_58, %c0_59] : memref<4x9x9x128xbf16, #tpu.memory_space<vmem>>, vector<1x8x8x128xbf16>
    %58 = vector.shape_cast %57 : vector<1x8x8x128xbf16> to vector<8x8x128xbf16>
    %59 = vector.shape_cast %58 : vector<8x8x128xbf16> to vector<64x128xbf16>
    %c8 = arith.constant 8 : index
    %c0_60 = arith.constant 0 : index
    %c0_61 = arith.constant 0 : index
    %60 = vector.load %arg2[%c8, %c0_60, %c0_61] : memref<9x128x128xbf16, #tpu.memory_space<vmem>>, vector<1x128x128xbf16>
    %61 = vector.shape_cast %60 : vector<1x128x128xbf16> to vector<128x128xbf16>
    %cst_62 = arith.constant dense<0.000000e+00> : vector<64x128xf32>
    %62 = tpu.matmul %59, %61, %cst_62 {dimension_numbers = #tpu.dot_dimension_numbers<[1], [0], [0], [1], [0, 0, 1, 1], [], []>} : vector<64x128xbf16>, vector<128x128xbf16>, vector<64x128xf32> -> vector<64x128xf32>
    %63 = arith.addf %56, %62 : vector<64x128xf32>
    %c0_63 = arith.constant 0 : index
    %c0_64 = arith.constant 0 : index
    %64 = vector.load %arg3[%c0_63, %c0_64] : memref<1x128xf32, #tpu.memory_space<vmem>>, vector<1x128xf32>
    %65 = vector.broadcast %64 : vector<1x128xf32> to vector<64x128xf32>
    %66 = arith.addf %63, %65 : vector<64x128xf32>
    %cst_65 = arith.constant 0.000000e+00 : f32
    %67 = vector.broadcast %cst_65 : f32 to vector<64x128xf32>
    %68 = arith.maximumf %66, %67 : vector<64x128xf32>
    %69 = arith.truncf %68 : vector<64x128xf32> to vector<64x128xbf16>
    %c0_66 = arith.constant 0 : index
    %c0_67 = arith.constant 0 : index
    %c0_68 = arith.constant 0 : index
    %70 = vector.load %arg4[%c0_66, %c0_67, %c0_68] : memref<1x64x128xbf16, #tpu.memory_space<vmem>>, vector<1x64x128xbf16>
    %71 = vector.shape_cast %70 : vector<1x64x128xbf16> to vector<64x128xbf16>
    %72 = vector.shape_cast %69 : vector<64x128xbf16> to vector<1x64x128xbf16>
    tpu.vector_store %arg4[%c0_66, %c0_67, %c0_68], %72 {strides = array<i32>} : memref<1x64x128xbf16, #tpu.memory_space<vmem>>, vector<1x64x128xbf16>,
    return
  }
  func.func @transform_0(%arg0: i32) -> (i32, i32, i32, i32) {
    %c0_i32 = arith.constant 0 : i32
    %c0_i32_0 = arith.constant 0 : i32
    %c0_i32_1 = arith.constant 0 : i32
    %c0_i32_2 = arith.constant 0 : i32
    return %arg0, %c0_i32, %c0_i32_0, %c0_i32_1 : i32, i32, i32, i32
  }
  func.func @transform_1(%arg0: i32) -> (i32, i32, i32) {
    %c0_i32 = arith.constant 0 : i32
    %c0_i32_0 = arith.constant 0 : i32
    %c0_i32_1 = arith.constant 0 : i32
    %c0_i32_2 = arith.constant 0 : i32
    return %c0_i32, %c0_i32_0, %c0_i32_1 : i32, i32, i32
  }
  func.func @transform_2(%arg0: i32) -> (i32, i32) {
    %c0_i32 = arith.constant 0 : i32
    %c0_i32_0 = arith.constant 0 : i32
    %c0_i32_1 = arith.constant 0 : i32
    return %c0_i32, %c0_i32_0 : i32, i32
  }
  func.func @transform_3(%arg0: i32) -> (i32, i32, i32) {
    %c0_i32 = arith.constant 0 : i32
    %c0_i32_0 = arith.constant 0 : i32
    %c0_i32_1 = arith.constant 0 : i32
    return %arg0, %c0_i32, %c0_i32_0 : i32, i32, i32
  }
}

module attributes {stable_mosaic.version = 11 : i64} {
  func.func @_mm_bias_proj_res_relu_kernel(%arg0: i32, %arg1: i32, %arg2: memref<128x128xbf16, #tpu.memory_space<vmem>>, %arg3: memref<128x128xbf16, #tpu.memory_space<vmem>>, %arg4: memref<1x128xf32, #tpu.memory_space<vmem>>, %arg5: memref<128x16xbf16, #tpu.memory_space<vmem>>, %arg6: memref<16x128xbf16, #tpu.memory_space<vmem>>, %arg7: memref<1x128xf32, #tpu.memory_space<vmem>>, %arg8: memref<128x128xf32, #tpu.memory_space<vmem>>) attributes {dimension_semantics = [#tpu.dimension_semantics<parallel>, #tpu.dimension_semantics<parallel>], iteration_bounds = array<i64: 1, 1>, scalar_prefetch = 0 : i64, scratch_operands = 0 : i64, tpu.core_type = #tpu.core_type<tc>, window_params = [{transform_indices = @transform_0, window_bounds = array<i64: 128, 128>}, {transform_indices = @transform_1, window_bounds = array<i64: 128, 128>}, {transform_indices = @transform_2, window_bounds = array<i64: 1, 128>}, {transform_indices = @transform_3, window_bounds = array<i64: 128, 16>}, {transform_indices = @transform_4, window_bounds = array<i64: 16, 128>}, {transform_indices = @transform_5, window_bounds = array<i64: 1, 128>}, {transform_indices = @transform_6, window_bounds = array<i64: 128, 128>}]} {
    %c0 = arith.constant 0 : index
    %c0_0 = arith.constant 0 : index
    %0 = vector.load %arg2[%c0, %c0_0] : memref<128x128xbf16, #tpu.memory_space<vmem>>, vector<128x128xbf16>
    %c0_1 = arith.constant 0 : index
    %c0_2 = arith.constant 0 : index
    %1 = vector.load %arg3[%c0_1, %c0_2] : memref<128x128xbf16, #tpu.memory_space<vmem>>, vector<128x128xbf16>
    %cst = arith.constant dense<0.000000e+00> : vector<128x128xf32>
    %2 = tpu.matmul %0, %1, %cst {dimension_numbers = #tpu.dot_dimension_numbers<[1], [0], [0], [1], [0, 0, 1, 1], [], []>} : vector<128x128xbf16>, vector<128x128xbf16>, vector<128x128xf32> -> vector<128x128xf32>
    %c0_3 = arith.constant 0 : index
    %c0_4 = arith.constant 0 : index
    %3 = vector.load %arg5[%c0_3, %c0_4] : memref<128x16xbf16, #tpu.memory_space<vmem>>, vector<128x16xbf16>
    %c0_5 = arith.constant 0 : index
    %c0_6 = arith.constant 0 : index
    %4 = vector.load %arg6[%c0_5, %c0_6] : memref<16x128xbf16, #tpu.memory_space<vmem>>, vector<16x128xbf16>
    %cst_7 = arith.constant dense<0.000000e+00> : vector<128x128xf32>
    %5 = tpu.matmul %3, %4, %cst_7 {dimension_numbers = #tpu.dot_dimension_numbers<[1], [0], [0], [1], [0, 0, 1, 1], [], []>} : vector<128x16xbf16>, vector<16x128xbf16>, vector<128x128xf32> -> vector<128x128xf32>
    %6 = arith.addf %2, %5 : vector<128x128xf32>
    %c0_8 = arith.constant 0 : index
    %c0_9 = arith.constant 0 : index
    %7 = vector.load %arg4[%c0_8, %c0_9] : memref<1x128xf32, #tpu.memory_space<vmem>>, vector<1x128xf32>
    %c0_10 = arith.constant 0 : index
    %c0_11 = arith.constant 0 : index
    %8 = vector.load %arg7[%c0_10, %c0_11] : memref<1x128xf32, #tpu.memory_space<vmem>>, vector<1x128xf32>
    %9 = arith.addf %7, %8 : vector<1x128xf32>
    %10 = vector.broadcast %9 : vector<1x128xf32> to vector<128x128xf32>
    %11 = arith.addf %6, %10 : vector<128x128xf32>
    %cst_12 = arith.constant 0.000000e+00 : f32
    %12 = vector.broadcast %cst_12 : f32 to vector<128x128xf32>
    %13 = arith.maximumf %11, %12 : vector<128x128xf32>
    %c0_13 = arith.constant 0 : index
    %c0_14 = arith.constant 0 : index
    %14 = vector.load %arg8[%c0_13, %c0_14] : memref<128x128xf32, #tpu.memory_space<vmem>>, vector<128x128xf32>
    tpu.vector_store %arg8[%c0_13, %c0_14], %13 {strides = array<i32>} : memref<128x128xf32, #tpu.memory_space<vmem>>, vector<128x128xf32>,
    return
  }
  func.func @transform_0(%arg0: i32, %arg1: i32) -> (i32, i32) {
    %c0_i32 = arith.constant 0 : i32
    %c0_i32_0 = arith.constant 0 : i32
    return %arg0, %c0_i32 : i32, i32
  }
  func.func @transform_1(%arg0: i32, %arg1: i32) -> (i32, i32) {
    %c0_i32 = arith.constant 0 : i32
    %c0_i32_0 = arith.constant 0 : i32
    return %c0_i32, %arg1 : i32, i32
  }
  func.func @transform_2(%arg0: i32, %arg1: i32) -> (i32, i32) {
    %c0_i32 = arith.constant 0 : i32
    %c0_i32_0 = arith.constant 0 : i32
    return %c0_i32, %arg1 : i32, i32
  }
  func.func @transform_3(%arg0: i32, %arg1: i32) -> (i32, i32) {
    %c0_i32 = arith.constant 0 : i32
    %c0_i32_0 = arith.constant 0 : i32
    return %arg0, %c0_i32 : i32, i32
  }
  func.func @transform_4(%arg0: i32, %arg1: i32) -> (i32, i32) {
    %c0_i32 = arith.constant 0 : i32
    %c0_i32_0 = arith.constant 0 : i32
    return %c0_i32, %arg1 : i32, i32
  }
  func.func @transform_5(%arg0: i32, %arg1: i32) -> (i32, i32) {
    %c0_i32 = arith.constant 0 : i32
    %c0_i32_0 = arith.constant 0 : i32
    return %c0_i32, %arg1 : i32, i32
  }
  func.func @transform_6(%arg0: i32, %arg1: i32) -> (i32, i32) {
    %c0_i32 = arith.constant 0 : i32
    return %arg0, %arg1 : i32, i32
  }
}

</mosaic_0001>

<bundles_post_ra>
// kernel: bottleneck_forward.3
= control target key start
LH: loop header
LB: loop body
LE: loop exit
PB: predicated region body
PF: predicated region fallthrough
CT: control target
= control target key end

     0   :  { %s967_s12 = smov 0   ;;  %s969_s13 = smov 0   ;;  %s1081_s0 = inlined_call_operand.vmem [shape: bf16[512,16], index: 0, kind: input, shape index: {}]   ;;  %s1082_s1 = inlined_call_operand.vmem [shape: bf16[16,128], index: 1, kind: input, shape index: {}]   ;;  %s1083_s2 = inlined_call_operand.vmem [shape: f32[1,128], index: 2, kind: input, shape index: {}]   ;;  %s1084_s3 = inlined_call_operand.vmem [shape: bf16[512,128], index: 3, kind: output, shape index: {}]  }
   0x1   :  { %s971_s14 = smov 0  }
   0x2 LB: > { %s25_s15 = sadd.s32 1, %s941_s13  ;;  %p692_p0 = scmp.ge.s32.totalorder %s945_s14, 1  ;;  %s945_s14 = sphi %s971_s14, %s13_s14   ;;  %s941_s13 = sphi %s969_s13, %s1086_s13   ;;  %s937_s12 = sphi %s967_s12, %s1085_s12  }
   0x3   : > { %p27_p1 = scmp.ge.s32.totalorder %s25_s15, 2  ;;  %p169_p2 = scmp.lt.s32.totalorder %s945_s14, 3 }
   0x5   : > { %s1088_s15 = smov (%p27_p1, %s25_s15), 0  ;;  %p170_p3 = pnand %p692_p0, %p169_p2 }
   0x6   : > { %s693_s18 = sshll.u32 (!%p170_p3), %s937_s12, 5 }
   0x7   : > { %173 = sbr.rel (%p170_p3) target bundleno = 214 (0xd6), region = 32  ;;  %p204_p4 = scmp.lt.s32.totalorder (!%p170_p3), %s693_s18, 63 }
   0xc   : > { %v799_v0 = vld [vmem:[%s1082_s1] sm:$0xff]  ;;  %s1090_s18 = smov (!%p204_p4, %s693_s18), 63  ;;  %vm350_vm0 = vcmask 130048  }
   0xd   : > { %406 = vmatpush.bf16.msra.mxu0 %v799_v0  ;;  %895 = vmatpush.bf16.msra.mxu1 %v799_v0  ;;  %s694_s19 = sshll.u32 %s1090_s18, 2  ;;  %v1015_v19 = vld [vmem:[%s1083_s2] ss:$0 sm:$0xff] }
   0xe   : > { %896 = vmatpush.bf16.msra.mxu2 %v799_v0  ;;  %897 = vmatpush.bf16.msra.mxu3 %v799_v0  ;;  %s207_s22 = scalar_lea.vmem %s1081_s0, %s694_s19  ;;  %s1026_s27 = scalar_lea.vmem %s1084_s3, %s694_s19 }
   0xf   : > { %v783_v1 = vld [vmem:[%s207_s22] sm:$0xff]  ;;  %v784_v5 = vld [vmem:[%s207_s22 + $0x8] sm:$0xff]  ;;  %v785_v9 = vld [vmem:[%s207_s22 + $0x10] sm:$0xff] }
  0x10   : > { %v787_v2 = vld [vmem:[%s207_s22 + $0x20] sm:$0xff]  ;;  %765 = vmatmul.msk.bf16.vlgmr.msra.gmra.mxu0 %vm350_vm0, %v783_v1  ;;  %v788_v6 = vld [vmem:[%s207_s22 + $0x28] sm:$0xff]  ;;  %v789_v10 = vld [vmem:[%s207_s22 + $0x30] sm:$0xff] }
  0x11   : > { %v791_v3 = vld [vmem:[%s207_s22 + $0x40] sm:$0xff]  ;;  %769 = vmatmul.msk.bf16.vlgmr.msra.gmra.mxu1 %vm350_vm0, %v787_v2  ;;  %v792_v7 = vld [vmem:[%s207_s22 + $0x48] sm:$0xff]  ;;  %v793_v11 = vld [vmem:[%s207_s22 + $0x50] sm:$0xff] }
  0x12   : > { %v795_v4 = vld [vmem:[%s207_s22 + $0x60] sm:$0xff]  ;;  %773 = vmatmul.msk.bf16.vlgmr.msra.gmra.mxu2 %vm350_vm0, %v791_v3  ;;  %v796_v8 = vld [vmem:[%s207_s22 + $0x68] sm:$0xff]  ;;  %v797_v12 = vld [vmem:[%s207_s22 + $0x70] sm:$0xff] }
  0x13   : > { %777 = vmatmul.msk.bf16.vlgmr.msra.gmra.mxu3 %vm350_vm0, %v795_v4  ;;  %v786_v13 = vld [vmem:[%s207_s22 + $0x18] sm:$0xff] }
  0x14   : > { %v790_v14 = vld [vmem:[%s207_s22 + $0x38] sm:$0xff] }
  0x15   : > { %v794_v15 = vld [vmem:[%s207_s22 + $0x58] sm:$0xff] }
  0x16   : > { %v798_v16 = vld [vmem:[%s207_s22 + $0x78] sm:$0xff] }
  0x20   : > { %766 = vmatmul.msk.bf16.gmra.mxu0 %vm350_vm0, %v784_v5 }
  0x21   : > { %770 = vmatmul.msk.bf16.gmra.mxu1 %vm350_vm0, %v788_v6 }
  0x22   : > { %774 = vmatmul.msk.bf16.gmra.mxu2 %vm350_vm0, %v792_v7 }
  0x23   : > { %778 = vmatmul.msk.bf16.gmra.mxu3 %vm350_vm0, %v796_v8 }
  0x30   : > { %767 = vmatmul.msk.bf16.gmra.mxu0 %vm350_vm0, %v785_v9 }
  0x31   : > { %771 = vmatmul.msk.bf16.gmra.mxu1 %vm350_vm0, %v789_v10 }
  0x32   : > { %775 = vmatmul.msk.bf16.gmra.mxu2 %vm350_vm0, %v793_v11 }
  0x33   : > { %779 = vmatmul.msk.bf16.gmra.mxu3 %vm350_vm0, %v797_v12 }
  0x40   : > { %768 = vmatmul.msk.bf16.gmra.mxu0 %vm350_vm0, %v786_v13 }
  0x41   : > { %772 = vmatmul.msk.bf16.gmra.mxu1 %vm350_vm0, %v790_v14 }
  0x42   : > { %776 = vmatmul.msk.bf16.gmra.mxu2 %vm350_vm0, %v794_v15 }
  0x43   : > { %780 = vmatmul.msk.bf16.gmra.mxu3 %vm350_vm0, %v798_v16 }
  0x8d   : > { %v408_v17 = vpop.f32.mrf.mxu0 }
  0x8e   : > { %v428_v18 = vpop.f32.mrf.mxu1  ;;  %v409_v20 = vadd.f32 %v1015_v19, %v408_v17 }
  0x8f   : > { %v429_v21 = vadd.f32 %v1015_v19, %v428_v18 }
  0x90   : > { %v488_v28 = vmax.f32 %v409_v20, 0.0 }
  0x91   : > { %v496_v29 = vmax.f32 %v429_v21, 0.0 }
  0x95   : > { %v448_v22 = vpop.f32.mrf.mxu2  ;;  %v410_v24 = vpop.f32.mrf.mxu0 }
  0x96   : > { %v468_v23 = vpop.f32.mrf.mxu3  ;;  %v430_v25 = vpop.f32.mrf.mxu1  ;;  %v411_v26 = vadd.f32 %v1015_v19, %v410_v24  ;;  %v449_v34 = vadd.f32 %v1015_v19, %v448_v22 }
  0x97   : > { %v431_v27 = vadd.f32 %v1015_v19, %v430_v25  ;;  %v469_v35 = vadd.f32 %v1015_v19, %v468_v23 }
  0x98   : > { %v489_v30 = vmax.f32 %v411_v26, 0.0  ;;  %v504_v42 = vmax.f32 %v449_v34, 0.0 }
  0x99   : > { %v497_v31 = vmax.f32 %v431_v27, 0.0  ;;  %v512_v43 = vmax.f32 %v469_v35, 0.0 }
  0x9a   : > { %v803_v32 = vpack.c.bf16 %v489_v30, %v488_v28 }
  0x9b   : > { %v823_v33 = vpack.c.bf16 %v497_v31, %v496_v29 }
  0x9c   : > { %804 = vst [vmem:[%s1026_s27] sm:$0xff] %v803_v32  }
  0x9d   : > { %v450_v36 = vpop.f32.mrf.mxu2  ;;  %883 = vst [vmem:[%s1026_s27 + $0x20] sm:$0xff] %v823_v33   ;;  %v413_v40 = vpop.f32.mrf.mxu0 }
  0x9e   : > { %v470_v37 = vpop.f32.mrf.mxu3  ;;  %v451_v38 = vadd.f32 %v1015_v19, %v450_v36  ;;  %v433_v41 = vpop.f32.mrf.mxu1  ;;  %v414_v48 = vadd.f32 %v1015_v19, %v413_v40 }
  0x9f   : > { %v471_v39 = vadd.f32 %v1015_v19, %v470_v37  ;;  %v434_v49 = vadd.f32 %v1015_v19, %v433_v41 }
  0xa0   : > { %v505_v44 = vmax.f32 %v451_v38, 0.0  ;;  %v490_v56 = vmax.f32 %v414_v48, 0.0 }
  0xa1   : > { %v513_v45 = vmax.f32 %v471_v39, 0.0  ;;  %v498_v57 = vmax.f32 %v434_v49, 0.0 }
  0xa2   : > { %v843_v46 = vpack.c.bf16 %v505_v44, %v504_v42 }
  0xa3   : > { %v863_v47 = vpack.c.bf16 %v513_v45, %v512_v43 }
  0xa4   : > { %887 = vst [vmem:[%s1026_s27 + $0x40] sm:$0xff] %v843_v46  }
  0xa5   : > { %891 = vst [vmem:[%s1026_s27 + $0x60] sm:$0xff] %v863_v47   ;;  %v453_v50 = vpop.f32.mrf.mxu2  ;;  %v415_v52 = vpop.f32.mrf.mxu0 }
  0xa6   : > { %v473_v51 = vpop.f32.mrf.mxu3  ;;  %v435_v53 = vpop.f32.mrf.mxu1  ;;  %v416_v54 = vadd.f32 %v1015_v19, %v415_v52  ;;  %v454_v62 = vadd.f32 %v1015_v19, %v453_v50 }
  0xa7   : > { %v436_v55 = vadd.f32 %v1015_v19, %v435_v53  ;;  %v474_v63 = vadd.f32 %v1015_v19, %v473_v51 }
  0xa8   : > { %v491_v58 = vmax.f32 %v416_v54, 0.0  ;;  %v506_v6 = vmax.f32 %v454_v62, 0.0 }
  0xa9   : > { %v499_v59 = vmax.f32 %v436_v55, 0.0  ;;  %v514_v7 = vmax.f32 %v474_v63, 0.0 }
  0xaa   : > { %v808_v60 = vpack.c.bf16 %v491_v58, %v490_v56 }
  0xab   : > { %v828_v61 = vpack.c.bf16 %v499_v59, %v498_v57 }
  0xac   : > { %880 = vst [vmem:[%s1026_s27 + $0x8] sm:$0xff] %v808_v60  }
  0xad   : > { %v455_v0 = vpop.f32.mrf.mxu2  ;;  %884 = vst [vmem:[%s1026_s27 + $0x28] sm:$0xff] %v828_v61   ;;  %v418_v4 = vpop.f32.mrf.mxu0 }
  0xae   : > { %v475_v1 = vpop.f32.mrf.mxu3  ;;  %v456_v2 = vadd.f32 %v1015_v19, %v455_v0  ;;  %v438_v5 = vpop.f32.mrf.mxu1  ;;  %v419_v12 = vadd.f32 %v1015_v19, %v418_v4 }
  0xaf   : > { %v476_v3 = vadd.f32 %v1015_v19, %v475_v1  ;;  %v439_v13 = vadd.f32 %v1015_v19, %v438_v5 }
  0xb0   : > { %v507_v8 = vmax.f32 %v456_v2, 0.0  ;;  %v492_v21 = vmax.f32 %v419_v12, 0.0 }
  0xb1   : > { %v515_v9 = vmax.f32 %v476_v3, 0.0  ;;  %v500_v22 = vmax.f32 %v439_v13, 0.0 }
  0xb2   : > { %v848_v10 = vpack.c.bf16 %v507_v8, %v506_v6 }
  0xb3   : > { %v868_v11 = vpack.c.bf16 %v515_v9, %v514_v7 }
  0xb4   : > { %888 = vst [vmem:[%s1026_s27 + $0x48] sm:$0xff] %v848_v10  }
  0xb5   : > { %892 = vst [vmem:[%s1026_s27 + $0x68] sm:$0xff] %v868_v11   ;;  %v458_v14 = vpop.f32.mrf.mxu2  ;;  %v420_v16 = vpop.f32.mrf.mxu0 }
  0xb6   : > { %v478_v15 = vpop.f32.mrf.mxu3  ;;  %v440_v17 = vpop.f32.mrf.mxu1  ;;  %v421_v18 = vadd.f32 %v1015_v19, %v420_v16  ;;  %v459_v27 = vadd.f32 %v1015_v19, %v458_v14 }
  0xb7   : > { %v441_v20 = vadd.f32 %v1015_v19, %v440_v17  ;;  %v479_v28 = vadd.f32 %v1015_v19, %v478_v15 }
  0xb8   : > { %v493_v23 = vmax.f32 %v421_v18, 0.0  ;;  %v508_v35 = vmax.f32 %v459_v27, 0.0 }
  0xb9   : > { %v501_v24 = vmax.f32 %v441_v20, 0.0  ;;  %v516_v36 = vmax.f32 %v479_v28, 0.0 }
  0xba   : > { %v813_v25 = vpack.c.bf16 %v493_v23, %v492_v21 }
  0xbb   : > { %v833_v26 = vpack.c.bf16 %v501_v24, %v500_v22 }
  0xbc   : > { %881 = vst [vmem:[%s1026_s27 + $0x10] sm:$0xff] %v813_v25  }
  0xbd   : > { %v460_v29 = vpop.f32.mrf.mxu2  ;;  %885 = vst [vmem:[%s1026_s27 + $0x30] sm:$0xff] %v833_v26   ;;  %v423_v33 = vpop.f32.mrf.mxu0 }
  0xbe   : > { %v480_v30 = vpop.f32.mrf.mxu3  ;;  %v461_v31 = vadd.f32 %v1015_v19, %v460_v29  ;;  %v443_v34 = vpop.f32.mrf.mxu1  ;;  %v424_v41 = vadd.f32 %v1015_v19, %v423_v33 }
  0xbf   : > { %v481_v32 = vadd.f32 %v1015_v19, %v480_v30  ;;  %v444_v42 = vadd.f32 %v1015_v19, %v443_v34 }
  0xc0   : > { %v509_v37 = vmax.f32 %v461_v31, 0.0  ;;  %v494_v49 = vmax.f32 %v424_v41, 0.0 }
  0xc1   : > { %v517_v38 = vmax.f32 %v481_v32, 0.0  ;;  %v502_v50 = vmax.f32 %v444_v42, 0.0 }
  0xc2   : > { %v853_v39 = vpack.c.bf16 %v509_v37, %v508_v35 }
  0xc3   : > { %v873_v40 = vpack.c.bf16 %v517_v38, %v516_v36 }
  0xc4   : > { %889 = vst [vmem:[%s1026_s27 + $0x50] sm:$0xff] %v853_v39  }
  0xc5   : > { %893 = vst [vmem:[%s1026_s27 + $0x70] sm:$0xff] %v873_v40   ;;  %v463_v43 = vpop.f32.mrf.mxu2  ;;  %v425_v45 = vpop.f32.mrf.mxu0 }
  0xc6   : > { %v483_v44 = vpop.f32.mrf.mxu3  ;;  %v445_v46 = vpop.f32.mrf.mxu1  ;;  %v426_v47 = vadd.f32 %v1015_v19, %v425_v45  ;;  %v464_v55 = vadd.f32 %v1015_v19, %v463_v43 }
  0xc7   : > { %v446_v48 = vadd.f32 %v1015_v19, %v445_v46  ;;  %v484_v56 = vadd.f32 %v1015_v19, %v483_v44 }
  0xc8   : > { %v495_v51 = vmax.f32 %v426_v47, 0.0  ;;  %v510_v61 = vmax.f32 %v464_v55, 0.0 }
  0xc9   : > { %v503_v52 = vmax.f32 %v446_v48, 0.0  ;;  %v518_v62 = vmax.f32 %v484_v56, 0.0 }
  0xca   : > { %v818_v53 = vpack.c.bf16 %v495_v51, %v494_v49 }
  0xcb   : > { %v838_v54 = vpack.c.bf16 %v503_v52, %v502_v50 }
  0xcc   : > { %882 = vst [vmem:[%s1026_s27 + $0x18] sm:$0xff] %v818_v53  }
  0xcd   : > { %v465_v57 = vpop.f32.mrf.mxu2  ;;  %886 = vst [vmem:[%s1026_s27 + $0x38] sm:$0xff] %v838_v54  }
  0xce   : > { %v485_v58 = vpop.f32.mrf.mxu3  ;;  %v466_v59 = vadd.f32 %v1015_v19, %v465_v57 }
  0xcf   : > { %v486_v60 = vadd.f32 %v1015_v19, %v485_v58 }
  0xd0   : > { %v511_v63 = vmax.f32 %v466_v59, 0.0 }
  0xd1   : > { %v519_v0 = vmax.f32 %v486_v60, 0.0 }
  0xd2   : > { %v858_v1 = vpack.c.bf16 %v511_v63, %v510_v61 }
  0xd3   : > { %v878_v2 = vpack.c.bf16 %v519_v0, %v518_v62 }
  0xd4   : > { %890 = vst [vmem:[%s1026_s27 + $0x58] sm:$0xff] %v858_v1  }
  0xd5   : > { %894 = vst [vmem:[%s1026_s27 + $0x78] sm:$0xff] %v878_v2  }
  0xd6 PF: > { %s13_s14 = sadd.s32 1, %s945_s14   ;;  %s1085_s12 = smov %s941_s13 }
  0xd7   : > { %p10_p5 = scmp.ge.s32.totalorder %s13_s14, 4   ;;  %s1086_s13 = smov %s1088_s15 }
  0xd9   :  { %12 = sbr.rel (!%p10_p5) target bundleno = 2 (0x2), region = 68 }

// kernel: bottleneck_forward.5
= control target key start
LH: loop header
LB: loop body
LE: loop exit
PB: predicated region body
PF: predicated region fallthrough
CT: control target
= control target key end

     0   :  { %vm121_vm0 = vcmask 130048   ;;  %s731_s0 = inlined_call_operand.vmem [shape: bf16[128,128], index: 0, kind: input, shape index: {}]   ;;  %s732_s1 = inlined_call_operand.vmem [shape: bf16[128,128], index: 1, kind: input, shape index: {}]   ;;  %s733_s2 = inlined_call_operand.vmem [shape: f32[1,128], index: 2, kind: input, shape index: {}]   ;;  %s734_s3 = inlined_call_operand.vmem [shape: bf16[128,16], index: 3, kind: input, shape index: {}]   ;;  %s735_s4 = inlined_call_operand.vmem [shape: bf16[16,128], index: 4, kind: input, shape index: {}]   ;;  %s736_s5 = inlined_call_operand.vmem [shape: f32[1,128], index: 5, kind: input, shape index: {}]   ;;  %s737_s6 = inlined_call_operand.hbm [shape: f32[128,128], index: 6, kind: output, shape index: {}]  }
   0x1   :  { %v544_v0 = vld [vmem:[%s735_s4] sm:$0xff]  ;;  %v535_v1 = vld [vmem:[%s732_s1 + $0x38] sm:$0xff]  ;;  %v534_v3 = vld [vmem:[%s732_s1 + $0x30] sm:$0xff] }
   0x2   :  { %v536_v2 = vld [vmem:[%s734_s3] sm:$0xff]  ;;  %153 = vmatpush.bf16.msra.mxu0 %v544_v0  ;;  %291 = vmatpush.bf16.msra.mxu1 %v535_v1 }
   0x3   :  { %546 = vmatpush.bf16.msra.mxu2 %v535_v1  ;;  %545 = vmatpush.bf16.msra.mxu3 %v544_v0 }
   0x4   :  { %11 = vsyncpa [#allocation3], 0  ;;  %v541_v4 = vld [vmem:[%s734_s3 + $0x28] sm:$0xff]  ;;  %v532_v6 = vld [vmem:[%s732_s1 + $0x20] sm:$0xff]  ;;  %s400_s24 = sshll.u32 %s737_s6, 4  ;;  %s584_s25 = smov 128   ;;  %s401_s24 = int_to_ptr.hbm [resolvable:$true] %s400_s24 }
   0x5   :  { %448 = vmatmul.msk.bf16.vlgmr.msra.gmra.mxu0 %vm121_vm0, %v536_v2  ;;  %v533_v5 = vld [vmem:[%s732_s1 + $0x28] sm:$0xff]  ;;  %v531_v7 = vld [vmem:[%s732_s1 + $0x18] sm:$0xff]  ;;  %v530_v9 = vld [vmem:[%s732_s1 + $0x10] sm:$0xff]  ;;  %s585_s26 = smov 8  }
   0x6   :  { %292 = vmatpush.bf16.msra.mxu1 %v534_v3  ;;  %453 = vmatmul.msk.bf16.vlgmr.msra.gmra.mxu3 %vm121_vm0, %v541_v4  ;;  %v537_v8 = vld [vmem:[%s734_s3 + $0x8] sm:$0xff]  ;;  %v542_v10 = vld [vmem:[%s734_s3 + $0x30] sm:$0xff]  ;;  %v528_v12 = vld [vmem:[%s732_s1] sm:$0xff] }
   0x7   :  { %547 = vmatpush.bf16.msra.mxu2 %v534_v3  ;;  %v529_v11 = vld [vmem:[%s732_s1 + $0x8] sm:$0xff]  ;;  %v520_v13 = vld [vmem:[%s731_s0] sm:$0xff]  ;;  %v538_v15 = vld [vmem:[%s734_s3 + $0x10] sm:$0xff] }
   0x8   :  { %v524_v14 = vld [vmem:[%s731_s0 + $0x20] sm:$0xff]  ;;  %v543_v16 = vld [vmem:[%s734_s3 + $0x38] sm:$0xff]  ;;  %v521_v17 = vld [vmem:[%s731_s0 + $0x8] sm:$0xff] }
   0x9   :  { %v525_v18 = vld [vmem:[%s731_s0 + $0x28] sm:$0xff]  ;;  %v539_v19 = vld [vmem:[%s734_s3 + $0x18] sm:$0xff]  ;;  %v522_v20 = vld [vmem:[%s731_s0 + $0x10] sm:$0xff] }
   0xa   :  { %293 = vmatpush.bf16.msra.mxu1 %v533_v5  ;;  %v526_v21 = vld [vmem:[%s731_s0 + $0x30] sm:$0xff]  ;;  %v540_v22 = vld [vmem:[%s734_s3 + $0x20] sm:$0xff]  ;;  %v523_v23 = vld [vmem:[%s731_s0 + $0x18] sm:$0xff] }
   0xb   :  { %548 = vmatpush.bf16.msra.mxu2 %v533_v5  ;;  %v527_v24 = vld [vmem:[%s731_s0 + $0x38] sm:$0xff]  ;;  %v340_v28 = vld [vmem:[%s733_s2] sm:$0x1]  ;;  %s583_s0 = smov [#allocation2]  }
   0xc   :  { %v341_v29 = vld [vmem:[%s736_s5] sm:$0x1]  ;;  %s398_s2 = sshll.u32 %s583_s0, 4  ;;  %s399_s2 = int_to_ptr.vmem [resolvable:$true] %s398_s2 }
   0xd   :  { %v342_v30 = vadd.f32 %v341_v29, %v340_v28 }
   0xe   :  { %294 = vmatpush.bf16.msra.mxu1 %v532_v6 }
   0xf   :  { %549 = vmatpush.bf16.msra.mxu2 %v532_v6  ;;  %v710_v32 = vperm.slane %v342_v30, 0 }
  0x12   :  { %295 = vmatpush.bf16.msra.mxu1 %v531_v7 }
  0x13   :  { %550 = vmatpush.bf16.msra.mxu2 %v531_v7 }
  0x15   :  { %449 = vmatmul.msk.bf16.gmra.mxu0 %vm121_vm0, %v537_v8 }
  0x16   :  { %296 = vmatpush.bf16.msra.mxu1 %v530_v9  ;;  %454 = vmatmul.msk.bf16.gmra.mxu3 %vm121_vm0, %v542_v10 }
  0x17   :  { %551 = vmatpush.bf16.msra.mxu2 %v530_v9 }
  0x1a   :  { %297 = vmatpush.bf16.msra.mxu1 %v529_v11 }
  0x1b   :  { %552 = vmatpush.bf16.msra.mxu2 %v529_v11 }
  0x1e   :  { %298 = vmatpush.bf16.msra.mxu1 %v528_v12 }
  0x1f   :  { %553 = vmatpush.bf16.msra.mxu2 %v528_v12 }
  0x21   :  { %299 = vmatmul.bf16.vlgmr.msra.gmra.mxu1 %v520_v13 }
  0x22   :  { %319 = vmatmul.bf16.vlgmr.msra.gmra.mxu2 %v524_v14 }
  0x25   :  { %450 = vmatmul.msk.bf16.gmra.mxu0 %vm121_vm0, %v538_v15 }
  0x26   :  { %455 = vmatmul.msk.bf16.gmra.mxu3 %vm121_vm0, %v543_v16 }
  0x31   :  { %304 = vmatmul.bf16.gmra.mxu1 %v521_v17 }
  0x32   :  { %324 = vmatmul.bf16.gmra.mxu2 %v525_v18 }
  0x35   :  { %451 = vmatmul.msk.bf16.gmra.mxu0 %vm121_vm0, %v539_v19 }
  0x41   :  { %309 = vmatmul.bf16.gmra.mxu1 %v522_v20 }
  0x42   :  { %329 = vmatmul.bf16.gmra.mxu2 %v526_v21 }
  0x45   :  { %452 = vmatmul.msk.bf16.gmra.mxu0 %vm121_vm0, %v540_v22 }
  0x51   :  { %314 = vmatmul.bf16.gmra.mxu1 %v523_v23 }
  0x52   :  { %334 = vmatmul.bf16.gmra.mxu2 %v527_v24 }
  0x82   :  { %v155_v25 = vpop.f32.mrf.mxu0 }
  0x89   :  { %v180_v44 = vpop.f32.mrf.mxu3 }
  0x8a   :  { %v157_v26 = vpop.f32.mrf.mxu0 }
  0x91   :  { %v182_v51 = vpop.f32.mrf.mxu3 }
  0x92   :  { %v160_v27 = vpop.f32.mrf.mxu0 }
  0x99   :  { %v185_v0 = vpop.f32.mrf.mxu3 }
  0x9a   :  { %v162_v31 = vpop.f32.mrf.mxu0 }
  0x9e   :  { %v300_v33 = vpop.f32.mrf.mxu1 }
  0x9f   :  { %v301_v34 = vadd.f32 %v300_v33, %v155_v25 }
  0xa1   :  { %v346_v35 = vadd.f32 %v710_v32, %v301_v34  ;;  %v187_v15 = vpop.f32.mrf.mxu3 }
  0xa2   :  { %v165_v36 = vpop.f32.mrf.mxu0 }
  0xa3   :  { %v362_v37 = vmax.f32 %v346_v35, 0.0 }
  0xa5   :  { %378 = vst [vmem:[#allocation2] sm:$0xff] %v362_v37  ;;  %v320_v38 = vpop.f32.mrf.mxu2 }
  0xa6   :  { %v302_v39 = vpop.f32.mrf.mxu1 }
  0xa7   :  { %v303_v40 = vadd.f32 %v302_v39, %v157_v26 }
  0xa9   :  { %v347_v41 = vadd.f32 %v710_v32, %v303_v40  ;;  %v190_v30 = vpop.f32.mrf.mxu3 }
  0xaa   :  { %v167_v42 = vpop.f32.mrf.mxu0 }
  0xab   :  { %v363_v43 = vmax.f32 %v347_v41, 0.0 }
  0xad   :  { %379 = vst [vmem:[#allocation2 + $0x8] sm:$0xff] %v363_v43  ;;  %v322_v45 = vpop.f32.mrf.mxu2 }
  0xae   :  { %v305_v46 = vpop.f32.mrf.mxu1 }
  0xaf   :  { %v306_v47 = vadd.f32 %v305_v46, %v160_v27 }
  0xb1   :  { %v348_v48 = vadd.f32 %v710_v32, %v306_v47  ;;  %v192_v41 = vpop.f32.mrf.mxu3 }
  0xb2   :  { %v170_v49 = vpop.f32.mrf.mxu0 }
  0xb3   :  { %v364_v50 = vmax.f32 %v348_v48, 0.0 }
  0xb5   :  { %380 = vst [vmem:[#allocation2 + $0x10] sm:$0xff] %v364_v50  ;;  %v325_v52 = vpop.f32.mrf.mxu2 }
  0xb6   :  { %v326_v53 = vadd.f32 %v325_v52, %v180_v44  ;;  %v307_v54 = vpop.f32.mrf.mxu1 }
  0xb7   :  { %v308_v55 = vadd.f32 %v307_v54, %v162_v31 }
  0xb8   :  { %v356_v56 = vadd.f32 %v710_v32, %v326_v53 }
  0xb9   :  { %v349_v57 = vadd.f32 %v710_v32, %v308_v55 }
  0xba   :  { %v372_v58 = vmax.f32 %v356_v56, 0.0  ;;  %v172_v59 = vpop.f32.mrf.mxu0 }
  0xbb   :  { %v365_v60 = vmax.f32 %v349_v57, 0.0 }
  0xbc   :  { %388 = vst [vmem:[#allocation2 + $0x50] sm:$0xff] %v372_v58 }
  0xbd   :  { %381 = vst [vmem:[#allocation2 + $0x18] sm:$0xff] %v365_v60  ;;  %v327_v61 = vpop.f32.mrf.mxu2 }
  0xbe   :  { %v328_v62 = vadd.f32 %v327_v61, %v182_v51  ;;  %v310_v63 = vpop.f32.mrf.mxu1 }
  0xbf   :  { %v311_v1 = vadd.f32 %v310_v63, %v165_v36 }
  0xc0   :  { %v357_v2 = vadd.f32 %v710_v32, %v328_v62 }
  0xc1   :  { %v350_v3 = vadd.f32 %v710_v32, %v311_v1 }
  0xc2   :  { %v373_v4 = vmax.f32 %v357_v2, 0.0  ;;  %v175_v5 = vpop.f32.mrf.mxu0 }
  0xc3   :  { %v366_v6 = vmax.f32 %v350_v3, 0.0  ;;  %v321_v7 = vadd.f32 %v320_v38, %v175_v5 }
  0xc4   :  { %389 = vst [vmem:[#allocation2 + $0x58] sm:$0xff] %v373_v4 }
  0xc5   :  { %382 = vst [vmem:[#allocation2 + $0x20] sm:$0xff] %v366_v6  ;;  %v354_v8 = vadd.f32 %v710_v32, %v321_v7  ;;  %v330_v9 = vpop.f32.mrf.mxu2 }
  0xc6   :  { %v331_v10 = vadd.f32 %v330_v9, %v185_v0  ;;  %v312_v11 = vpop.f32.mrf.mxu1 }
  0xc7   :  { %v370_v12 = vmax.f32 %v354_v8, 0.0  ;;  %v313_v13 = vadd.f32 %v312_v11, %v167_v42 }
  0xc8   :  { %v358_v14 = vadd.f32 %v710_v32, %v331_v10 }
  0xc9   :  { %386 = vst [vmem:[#allocation2 + $0x40] sm:$0xff] %v370_v12  ;;  %v351_v16 = vadd.f32 %v710_v32, %v313_v13 }
  0xca   :  { %v374_v17 = vmax.f32 %v358_v14, 0.0  ;;  %v177_v18 = vpop.f32.mrf.mxu0 }
  0xcb   :  { %v367_v19 = vmax.f32 %v351_v16, 0.0  ;;  %v323_v20 = vadd.f32 %v322_v45, %v177_v18 }
  0xcc   :  { %390 = vst [vmem:[#allocation2 + $0x60] sm:$0xff] %v374_v17 }
  0xcd   :  { %383 = vst [vmem:[#allocation2 + $0x28] sm:$0xff] %v367_v19  ;;  %v355_v21 = vadd.f32 %v710_v32, %v323_v20  ;;  %v332_v22 = vpop.f32.mrf.mxu2 }
  0xce   :  { %v333_v23 = vadd.f32 %v332_v22, %v187_v15  ;;  %v315_v24 = vpop.f32.mrf.mxu1 }
  0xcf   :  { %v371_v25 = vmax.f32 %v355_v21, 0.0  ;;  %v316_v26 = vadd.f32 %v315_v24, %v170_v49 }
  0xd0   :  { %v359_v27 = vadd.f32 %v710_v32, %v333_v23 }
  0xd1   :  { %387 = vst [vmem:[#allocation2 + $0x48] sm:$0xff] %v371_v25  ;;  %v352_v28 = vadd.f32 %v710_v32, %v316_v26 }
  0xd2   :  { %v375_v29 = vmax.f32 %v359_v27, 0.0 }
  0xd3   :  { %v368_v31 = vmax.f32 %v352_v28, 0.0 }
  0xd4   :  { %391 = vst [vmem:[#allocation2 + $0x68] sm:$0xff] %v375_v29 }
  0xd5   :  { %384 = vst [vmem:[#allocation2 + $0x30] sm:$0xff] %v368_v31  ;;  %v335_v33 = vpop.f32.mrf.mxu2 }
  0xd6   :  { %v336_v34 = vadd.f32 %v335_v33, %v190_v30  ;;  %v317_v35 = vpop.f32.mrf.mxu1 }
  0xd7   :  { %v318_v36 = vadd.f32 %v317_v35, %v172_v59 }
  0xd8   :  { %v360_v37 = vadd.f32 %v710_v32, %v336_v34 }
  0xd9   :  { %v353_v38 = vadd.f32 %v710_v32, %v318_v36 }
  0xda   :  { %v376_v39 = vmax.f32 %v360_v37, 0.0 }
  0xdb   :  { %v369_v40 = vmax.f32 %v353_v38, 0.0 }
  0xdc   :  { %392 = vst [vmem:[#allocation2 + $0x70] sm:$0xff] %v376_v39 }
  0xdd   :  { %385 = vst [vmem:[#allocation2 + $0x38] sm:$0xff] %v369_v40  ;;  %v337_v42 = vpop.f32.mrf.mxu2 }
  0xde   :  { %v338_v43 = vadd.f32 %v337_v42, %v192_v41 }
  0xe0   :  { %v361_v44 = vadd.f32 %v710_v32, %v338_v43 }
  0xe2   :  { %v377_v45 = vmax.f32 %v361_v44, 0.0 }
  0xe4   :  { %393 = vst [vmem:[#allocation2 + $0x78] sm:$0xff] %v377_v45 }
  0xe5   :  { %406 = dma.vmem_to_hbm [thread:$0]  %s399_s2, 2048, %s401_s24, [#allocation3], %s584_s25, %s584_s25, %s585_s26  }
  0xe6   :  { %581 = dma.done.wait [#allocation3], 2048  }
  0xe7   :  { %582 = vsyncadd [#allocation3], 4294965248 }
  0xe8   :  { %411 = vsyncpa [#allocation3], 1 }

// kernel: bottleneck_forward.4
= control target key start
LH: loop header
LB: loop body
LE: loop exit
PB: predicated region body
PF: predicated region fallthrough
CT: control target
= control target key end

     0   :  { %s2569_s12 = smov 0   ;;  %s3009_s0 = inlined_call_operand.vmem [shape: bf16[8,9,9,128], index: 0, kind: input, shape index: {}]   ;;  %s3010_s1 = inlined_call_operand.vmem [shape: bf16[9,128,128], index: 1, kind: input, shape index: {}]   ;;  %s3011_s2 = inlined_call_operand.vmem [shape: f32[1,128], index: 2, kind: input, shape index: {}]   ;;  %s3012_s3 = inlined_call_operand.vmem [shape: bf16[2,64,128], index: 3, kind: output, shape index: {}]  }
   0x1 LB: > { %s2575_s13 = sadd.s32 4294967295, %s2547_s12   ;;  %p1804_p0 = scmp.ge.s32.totalorder %s2547_s12, 1  ;;  %s2547_s12 = sphi %s2569_s12, %s13_s12  }
   0x2   : > { %p139_p1 = scmp.lt.s32.totalorder %s2547_s12, 3 }
   0x4   : > { %p140_p2 = pnand %p1804_p0, %p139_p1 }
   0x5   : > { %s1805_s16 = sshll.u32 (!%p140_p2), %s2575_s13, 2  ;;  %p171_p4 = scmp.lt.s32.totalorder (!%p140_p2), %s2575_s13, 1 }
   0x6   : > { %143 = sbr.rel (%p140_p2) target bundleno = 336 (0x150), region = 32  ;;  %p165_p3 = scmp.lt.s32.totalorder (!%p140_p2), %s1805_s16, 7 }
   0xb   : > { %v2419_v0 = vld [vmem:[%s3010_s1 + $0x78] sm:$0xff]  ;;  %v2418_v2 = vld [vmem:[%s3010_s1 + $0x70] sm:$0xff]  ;;  %s3016_s16 = smov (!%p165_p3, %s1805_s16), 7  ;;  %v2417_v6 = vld [vmem:[%s3010_s1 + $0x68] sm:$0xff]  ;;  %vm444_vm0 = vsmask.f32 3328 }
   0xc   : > { %v2427_v1 = vld [vmem:[%s3010_s1 + $0xb8] sm:$0xff]  ;;  %2515 = vmatpush.bf16.msra.mxu1 %v2419_v0  ;;  %298 = vmatpush.bf16.msra.mxu0 %v2419_v0  ;;  %v2426_v3 = vld [vmem:[%s3010_s1 + $0xb0] sm:$0xff]  ;;  %s2531_s27 = smul.u32 72, %s3016_s16  ;;  %v2425_v7 = vld [vmem:[%s3010_s1 + $0xa8] sm:$0xff]  ;;  %vm445_vm1 = vsmask.f32 7440 }
   0xd   : > { %640 = vmatpush.bf16.msra.mxu2 %v2427_v1  ;;  %v2439_v4 = vld [vmem:[%s3010_s1 + $0xf8] sm:$0xff]  ;;  %v2438_v5 = vld [vmem:[%s3010_s1 + $0xf0] sm:$0xff]  ;;  %v2437_v8 = vld [vmem:[%s3010_s1 + $0xe8] sm:$0xff]  ;;  %s3018_s13 = smov (!%p171_p4, %s2575_s13), 1 }
   0xe   : > { %775 = vmatpush.bf16.msra.mxu3 %v2439_v4  ;;  %s2607_s7 = scalar_lea.vmem %s3009_s0, %s2531_s27  ;;  %v2416_v10 = vld [vmem:[%s3010_s1 + $0x60] sm:$0xff]  ;;  %v2415_v23 = vld [vmem:[%s3010_s1 + $0x58] sm:$0xff]  ;;  %v2414_v31 = vld [vmem:[%s3010_s1 + $0x50] sm:$0xff]  ;;  %s2395_s19 = sshll.u32 %s3018_s13, 5 }
   0xf   : > { %v428_v9 = vld [vmem:[%s2607_s7] sm:$0xf]  ;;  %v430_v11 = vld [vmem:[%s2607_s7 + $0x8] sm:$0xf]  ;;  %v429_v16 = vld [vmem:[%s2607_s7 + $0x4] sm:$0x1]  ;;  %s2985_s22 = scalar_lea.vmem %s3012_s3, %s2395_s19 }
  0x10   : > { %2516 = vmatpush.bf16.msra.mxu1 %v2418_v2  ;;  %299 = vmatpush.bf16.msra.mxu0 %v2418_v2  ;;  %v2424_v12 = vld [vmem:[%s3010_s1 + $0xa0] sm:$0xff]  ;;  %v448_v13 = vshrl.u32 %v428_v9, 16  ;;  %v451_v14 = vshll.u32 %v428_v9, 16  ;;  %v462_v15 = vshrl.u32 %v430_v11, 16  ;;  %v431_v17 = vld [vmem:[%s2607_s7 + $0xc] sm:$0x1]  ;;  %vm2641_vm2 = vmor %vm444_vm0, %vm445_vm1 }
  0x11   : > { %641 = vmatpush.bf16.msra.mxu2 %v2426_v3  ;;  %v465_v18 = vshll.u32 %v430_v11, 16  ;;  %v2436_v19 = vld [vmem:[%s3010_s1 + $0xe0] sm:$0xff]  ;;  %v2423_v25 = vld [vmem:[%s3010_s1 + $0x98] sm:$0xff]  ;;  %v457_v27 = vshll.u32 %v429_v16, 16  ;;  %v471_v28 = vshll.u32 %v431_v17, 16  ;;  %v2422_v32 = vld [vmem:[%s3010_s1 + $0x90] sm:$0xff] }
  0x12   : > { %776 = vmatpush.bf16.msra.mxu3 %v2438_v5  ;;  %v450_v20 = vrot.slane %v448_v13, 4  ;;  %v453_v21 = vrot.slane %v451_v14, 5  ;;  %v464_v22 = vrot.slane %v462_v15, 4  ;;  %v2435_v30 = vld [vmem:[%s3010_s1 + $0xd8] sm:$0xff]  ;;  %v432_v37 = vld [vmem:[%s2607_s7 + $0x10] sm:$0xf] }
  0x13   : > { %v467_v24 = vrot.slane %v465_v18, 5  ;;  %v459_v34 = vrot.slane %v457_v27, 5  ;;  %v473_v36 = vrot.slane %v471_v28, 5  ;;  %v434_v39 = vld [vmem:[%s2607_s7 + $0x18] sm:$0xf]  ;;  %v2434_v40 = vld [vmem:[%s3010_s1 + $0xd0] sm:$0xff] }
  0x14   : > { %2517 = vmatpush.bf16.msra.mxu1 %v2417_v6  ;;  %300 = vmatpush.bf16.msra.mxu0 %v2417_v6  ;;  %v454_v26 = vor.u32 %v453_v21, %v450_v20  ;;  %v2413_v41 = vld [vmem:[%s3010_s1 + $0x48] sm:$0xff]  ;;  %v476_v42 = vshrl.u32 %v432_v37, 16  ;;  %v479_v43 = vshll.u32 %v432_v37, 16  ;;  %v490_v47 = vshrl.u32 %v434_v39, 16  ;;  %v2412_v49 = vld [vmem:[%s3010_s1 + $0x40] sm:$0xff]  ;;  %v2407_v51 = vld [vmem:[%s3010_s1 + $0x38] sm:$0xff] }
  0x15   : > { %642 = vmatpush.bf16.msra.mxu2 %v2425_v7  ;;  %v468_v29 = vor.u32 %v467_v24, %v464_v22  ;;  %v2421_v44 = vld [vmem:[%s3010_s1 + $0x88] sm:$0xff]  ;;  %v493_v48 = vshll.u32 %v434_v39, 16  ;;  %v2420_v52 = vld [vmem:[%s3010_s1 + $0x80] sm:$0xff]  ;;  %v2410_v54 = vld [vmem:[%s2607_s7 + $0x6c] sm:$0xf0] }
  0x16   : > { %777 = vmatpush.bf16.msra.mxu3 %v2437_v8  ;;  %v455_v33 = vrot.slane %v454_v26, 4  ;;  %v1843_v50 = vld [vmem:[%s2607_s7 + $0x68] sm:$0xf]  ;;  %v2408_v56 = vld [vmem:[%s2607_s7 + $0x4c] sm:$0xf0]  ;;  %v478_v60 = vrot.slane %v476_v42, 4 }
  0x17   : > { %v469_v35 = vrot.slane %v468_v29, 4  ;;  %v2433_v53 = vld [vmem:[%s3010_s1 + $0xc8] sm:$0xff]  ;;  %v433_v59 = vld [vmem:[%s2607_s7 + $0x14] sm:$0x1]  ;;  %v481_v61 = vrot.slane %v479_v43, 5  ;;  %v492_v62 = vrot.slane %v490_v47, 4  ;;  %v1844_v3 = vor.u32 %v2410_v54, %v1843_v50 }
  0x18   : > { %2518 = vmatpush.bf16.msra.mxu1 %v2416_v10  ;;  %301 = vmatpush.bf16.msra.mxu0 %v2416_v10  ;;  %v460_v45 = vsel %vm2641_vm2, %v455_v33, %v459_v34  ;;  %v1835_v55 = vld [vmem:[%s2607_s7 + $0x48] sm:$0xf]  ;;  %v495_v63 = vrot.slane %v493_v48, 5  ;;  %v2451_v0 = vld [vmem:[%s3010_s1 + $0x138] sm:$0xff]  ;;  %v2432_v6 = vld [vmem:[%s3010_s1 + $0xc0] sm:$0xff]  ;;  %v485_v9 = vshll.u32 %v433_v59, 16 }
  0x19   : > { %643 = vmatpush.bf16.msra.mxu2 %v2424_v12  ;;  %v474_v46 = vsel %vm2641_vm2, %v469_v35, %v473_v36  ;;  %v576_v57 = vunpack.c.l.b16 %v460_v45  ;;  %v2471_v1 = vld [vmem:[%s3010_s1 + $0x1b8] sm:$0xff]  ;;  %v1836_v4 = vor.u32 %v2408_v56, %v1835_v55  ;;  %v2003_v7 = vld [vmem:[%s2607_s7 + $0x90] sm:$0xf]  ;;  %v482_v11 = vor.u32 %v481_v61, %v478_v60  ;;  %v2405_v18 = vld [vmem:[%s3010_s1 + $0x28] sm:$0xff] }
  0x1a   : > { %778 = vmatpush.bf16.msra.mxu3 %v2436_v19  ;;  %v577_v58 = vunpack.c.l.b16 %v474_v46  ;;  %v435_v2 = vld [vmem:[%s2607_s7 + $0x1c] sm:$0x1]  ;;  %v2428_v8 = vld [vmem:[%s2607_s7 + $0x94] sm:$0xf0]  ;;  %v2406_v10 = vld [vmem:[%s3010_s1 + $0x30] sm:$0xff]  ;;  %v496_v12 = vor.u32 %v495_v63, %v492_v62  ;;  %v487_v19 = vrot.slane %v485_v9, 5 }
  0x1b   : > { %v499_v13 = vshll.u32 %v435_v2, 16  ;;  %v2483_v14 = vld [vmem:[%s3010_s1 + $0x1f8] sm:$0xff]  ;;  %v2450_v15 = vld [vmem:[%s3010_s1 + $0x130] sm:$0xff]  ;;  %v2004_v17 = vor.u32 %v2428_v8, %v2003_v7  ;;  %v483_v20 = vrot.slane %v482_v11, 4  ;;  %v436_v24 = vld [vmem:[%s2607_s7 + $0x20] sm:$0xf] }
  0x1c   : > { %2519 = vmatpush.bf16.msra.mxu1 %v2415_v23  ;;  %302 = vmatpush.bf16.msra.mxu0 %v2415_v23  ;;  %v584_v5 = vpack.c.b16 %v577_v58, %v576_v57  ;;  %v2470_v16 = vld [vmem:[%s3010_s1 + $0x1b0] sm:$0xff]  ;;  %v497_v21 = vrot.slane %v496_v12, 4  ;;  %v2469_v26 = vld [vmem:[%s3010_s1 + $0x1a8] sm:$0xff]  ;;  %v504_v28 = vshrl.u32 %v436_v24, 16  ;;  %v507_v29 = vshll.u32 %v436_v24, 16  ;;  %v2448_v36 = vld [vmem:[%s3010_s1 + $0x120] sm:$0xff] }
  0x1d   : > { %644 = vmatpush.bf16.msra.mxu2 %v2423_v25  ;;  %v501_v22 = vrot.slane %v499_v13, 5  ;;  %v2482_v23 = vld [vmem:[%s3010_s1 + $0x1f0] sm:$0xff]  ;;  %v2449_v25 = vld [vmem:[%s3010_s1 + $0x128] sm:$0xff]  ;;  %v2468_v37 = vld [vmem:[%s3010_s1 + $0x1a0] sm:$0xff] }
  0x1e   : > { %779 = vmatpush.bf16.msra.mxu3 %v2435_v30  ;;  %v438_v27 = vld [vmem:[%s2607_s7 + $0x28] sm:$0xf]  ;;  %v2404_v30 = vld [vmem:[%s3010_s1 + $0x20] sm:$0xff]  ;;  %v1847_v39 = vld [vmem:[%s2607_s7 + $0x78] sm:$0xf]  ;;  %v506_v45 = vrot.slane %v504_v28, 4 }
  0x1f   : > { %v518_v33 = vshrl.u32 %v438_v27, 16  ;;  %v521_v34 = vshll.u32 %v438_v27, 16  ;;  %v2481_v35 = vld [vmem:[%s3010_s1 + $0x1e8] sm:$0xff]  ;;  %v2409_v42 = vld [vmem:[%s2607_s7 + $0x5c] sm:$0xf0]  ;;  %v509_v46 = vrot.slane %v507_v29, 5 }
  0x20   : > { %2520 = vmatpush.bf16.msra.mxu1 %v2414_v31  ;;  %303 = vmatpush.bf16.msra.mxu0 %v2414_v31  ;;  %v488_v31 = vsel %vm2641_vm2, %v483_v20, %v487_v19  ;;  %v2403_v47 = vld [vmem:[%s3010_s1 + $0x18] sm:$0xff]  ;;  %v2007_v56 = vld [vmem:[%s2607_s7 + $0xa0] sm:$0xf]  ;;  %v2429_v57 = vld [vmem:[%s2607_s7 + $0xa4] sm:$0xf0] }
  0x21   : > { %645 = vmatpush.bf16.msra.mxu2 %v2422_v32  ;;  %v502_v32 = vsel %vm2641_vm2, %v497_v21, %v501_v22  ;;  %v578_v43 = vunpack.c.l.b16 %v488_v31  ;;  %v520_v48 = vrot.slane %v518_v33, 4  ;;  %v2447_v50 = vld [vmem:[%s3010_s1 + $0x118] sm:$0xff]  ;;  %v510_v58 = vor.u32 %v509_v46, %v506_v45  ;;  %v2402_v59 = vld [vmem:[%s3010_s1 + $0x10] sm:$0xff]  ;;  %v2401_v2 = vld [vmem:[%s3010_s1 + $0x8] sm:$0xff] }
  0x22   : > { %780 = vmatpush.bf16.msra.mxu3 %v2434_v40  ;;  %v2411_v40 = vld [vmem:[%s2607_s7 + $0x7c] sm:$0xf0]  ;;  %v2446_v63 = vld [vmem:[%s3010_s1 + $0x110] sm:$0xff]  ;;  %v2445_v9 = vld [vmem:[%s3010_s1 + $0x108] sm:$0xff] }
  0x23   : > { %v2480_v7 = vld [vmem:[%s3010_s1 + $0x1e0] sm:$0xff]  ;;  %v440_v8 = vld [vmem:[%s2607_s7 + $0x30] sm:$0xf]  ;;  %v2459_v20 = vld [vmem:[%s3010_s1 + $0x178] sm:$0xff] }
  0x24   : > { %2521 = vmatpush.bf16.msra.mxu1 %v2413_v41  ;;  %304 = vmatpush.bf16.msra.mxu0 %v2413_v41  ;;  %v1839_v41 = vld [vmem:[%s2607_s7 + $0x58] sm:$0xf]  ;;  %v2466_v11 = vld [vmem:[%s3010_s1 + $0x190] sm:$0xff]  ;;  %v532_v12 = vshrl.u32 %v440_v8, 16  ;;  %v535_v13 = vshll.u32 %v440_v8, 16  ;;  %v2444_v21 = vld [vmem:[%s3010_s1 + $0x100] sm:$0xff] }
  0x25   : > { %646 = vmatpush.bf16.msra.mxu2 %v2421_v44  ;;  %v579_v44 = vunpack.c.l.b16 %v502_v32  ;;  %v1840_v54 = vor.u32 %v2409_v42, %v1839_v41  ;;  %v1883_v22 = vld [vmem:[%s2607_s7] sm:$0xf]  ;;  %v2491_v24 = vld [vmem:[%s3010_s1 + $0x238] sm:$0xff]  ;;  %v2458_v33 = vld [vmem:[%s3010_s1 + $0x170] sm:$0xff] }
  0x26   : > { %781 = vmatpush.bf16.msra.mxu3 %v2433_v53  ;;  %v1848_v53 = vor.u32 %v2411_v40, %v1847_v39  ;;  %v534_v29 = vrot.slane %v532_v12, 4  ;;  %v2011_v40 = vld [vmem:[%s2607_s7 + $0xb0] sm:$0xf]  ;;  %v2430_v41 = vld [vmem:[%s2607_s7 + $0xb4] sm:$0xf0]  ;;  %v2453_v12 = vld [vmem:[%s3010_s1 + $0x148] sm:$0xff] }
  0x27   : > { %v585_v55 = vpack.c.b16 %v579_v44, %v578_v43  ;;  %v2490_v43 = vld [vmem:[%s3010_s1 + $0x230] sm:$0xff] }
  0x28   : > { %2522 = vmatpush.bf16.msra.mxu1 %v2412_v49  ;;  %305 = vmatpush.bf16.msra.mxu0 %v2412_v49  ;;  %v523_v49 = vrot.slane %v521_v34, 5  ;;  %v441_v34 = vld [vmem:[%s2607_s7 + $0x34] sm:$0x1] }
  0x29   : > { %647 = vmatpush.bf16.msra.mxu2 %v2420_v52  ;;  %v439_v52 = vld [vmem:[%s2607_s7 + $0x2c] sm:$0x1]  ;;  %v541_v44 = vshll.u32 %v441_v34, 16  ;;  %v2331_v34 = vld [vmem:[%s2607_s7 + $0x10] sm:$0xf] }
  0x2a   : > { %782 = vmatpush.bf16.msra.mxu3 %v2432_v6  ;;  %v524_v61 = vor.u32 %v523_v49, %v520_v48  ;;  %v527_v62 = vshll.u32 %v439_v52, 16  ;;  %v2465_v48 = vld [vmem:[%s3010_s1 + $0x188] sm:$0xff]  ;;  %v2012_v49 = vor.u32 %v2430_v41, %v2011_v40 }
  0x2b   : > { %316 = vmatmul.bf16.vlgmr.msra.gmra.mxu1 %v1844_v3  ;;  %306 = vmatmul.bf16.vlgmr.msra.gmra.mxu0 %v1836_v4  ;;  %v511_v3 = vrot.slane %v510_v58, 4  ;;  %v2477_v58 = vld [vmem:[%s3010_s1 + $0x1c8] sm:$0xff] }
  0x2c   : > { %399 = vmatpush.bf16.msrb.mxu1 %v2407_v51  ;;  %910 = vmatpush.bf16.msrb.mxu0 %v2451_v0  ;;  %v437_v51 = vld [vmem:[%s2607_s7 + $0x24] sm:$0x1]  ;;  %v2008_v0 = vor.u32 %v2429_v57, %v2007_v56  ;;  %v529_v6 = vrot.slane %v527_v62, 5  ;;  %v2489_v56 = vld [vmem:[%s3010_s1 + $0x228] sm:$0xff]  ;;  %v2455_v62 = vld [vmem:[%s3010_s1 + $0x158] sm:$0xff] }
  0x2d   : > { %1291 = vmatpush.bf16.msrb.mxu2 %v2471_v1  ;;  %783 = vmatmul.bf16.vlgmr.msra.gmra.mxu3 %v2004_v17  ;;  %v513_v60 = vshll.u32 %v437_v51, 16  ;;  %v2467_v1 = vld [vmem:[%s3010_s1 + $0x198] sm:$0xff]  ;;  %v543_v51 = vrot.slane %v541_v44, 5  ;;  %v2456_v57 = vld [vmem:[%s3010_s1 + $0x160] sm:$0xff]  ;;  %v1895_v44 = vld [vmem:[%s2607_s7 + $0x30] sm:$0xf] }
  0x2e   : > { %648 = vmatmul.bf16.vlgmr.msra.gmra.mxu2 %v584_v5  ;;  %1426 = vmatpush.bf16.msrb.mxu3 %v2483_v14  ;;  %v525_v5 = vrot.slane %v524_v61, 4  ;;  %v2479_v14 = vld [vmem:[%s3010_s1 + $0x1d8] sm:$0xff] }
  0x2f   : > { %v515_v4 = vrot.slane %v513_v60, 5 }
  0x30   : > { %400 = vmatpush.bf16.msrb.mxu1 %v2406_v10  ;;  %911 = vmatpush.bf16.msrb.mxu0 %v2450_v15  ;;  %v442_v10 = vld [vmem:[%s2607_s7 + $0x38] sm:$0xf]  ;;  %v2400_v15 = vld [vmem:[%s3010_s1] sm:$0xff]  ;;  %v530_v17 = vsel %vm2641_vm2, %v525_v5, %v529_v6  ;;  %v2454_v5 = vld [vmem:[%s3010_s1 + $0x150] sm:$0xff] }
  0x31   : > { %1292 = vmatpush.bf16.msrb.mxu2 %v2470_v16  ;;  %v516_v16 = vsel %vm2641_vm2, %v511_v3, %v515_v4  ;;  %v549_v19 = vshll.u32 %v442_v10, 16  ;;  %v581_v28 = vunpack.c.l.b16 %v530_v17  ;;  %v1891_v17 = vld [vmem:[%s2607_s7 + $0x20] sm:$0xf] }
  0x32   : > { %1427 = vmatpush.bf16.msrb.mxu3 %v2482_v23  ;;  %v2396_v23 = vld [vmem:[%s2607_s7 + $0x4] sm:$0xf0]  ;;  %v580_v27 = vunpack.c.l.b16 %v516_v16  ;;  %v2486_v16 = vld [vmem:[%s3010_s1 + $0x210] sm:$0xff] }
  0x33   : > { %v551_v32 = vrot.slane %v549_v19, 5  ;;  %v2398_v19 = vld [vmem:[%s2607_s7 + $0x24] sm:$0xf0] }
  0x34   : > { %401 = vmatpush.bf16.msrb.mxu1 %v2405_v18  ;;  %912 = vmatpush.bf16.msrb.mxu0 %v2449_v25  ;;  %v546_v18 = vshrl.u32 %v442_v10, 16  ;;  %v2075_v25 = vld [vmem:[%s2607_s7 + $0xd8] sm:$0xf]  ;;  %v586_v39 = vpack.c.b16 %v581_v28, %v580_v27  ;;  %v2431_v10 = vld [vmem:[%s2607_s7 + $0xc4] sm:$0xf0] }
  0x35   : > { %1293 = vmatpush.bf16.msrb.mxu2 %v2469_v26  ;;  %v2440_v26 = vld [vmem:[%s2607_s7 + $0xdc] sm:$0xf0]  ;;  %v2283_v27 = vld [vmem:[%s2607_s7 + $0x50] sm:$0xf]  ;;  %v2472_v28 = vld [vmem:[%s2607_s7 + $0x54] sm:$0xf0] }
  0x36   : > { %1428 = vmatpush.bf16.msrb.mxu3 %v2481_v35  ;;  %v548_v31 = vrot.slane %v546_v18, 4  ;;  %v443_v35 = vld [vmem:[%s2607_s7 + $0x3c] sm:$0x1]  ;;  %v2485_v18 = vld [vmem:[%s3010_s1 + $0x208] sm:$0xff] }
  0x37   : > { %v555_v46 = vshll.u32 %v443_v35, 16 }
  0x38   : > { %402 = vmatpush.bf16.msrb.mxu1 %v2404_v30  ;;  %913 = vmatpush.bf16.msrb.mxu0 %v2448_v36  ;;  %v537_v30 = vrot.slane %v535_v13, 5  ;;  %v1884_v36 = vor.u32 %v2396_v23, %v1883_v22  ;;  %v552_v45 = vor.u32 %v551_v32, %v548_v31  ;;  %v2476_v13 = vld [vmem:[%s3010_s1 + $0x1c0] sm:$0xff]  ;;  %v2211_v22 = vld [vmem:[%s2607_s7 + $0x8] sm:$0xf]  ;;  %v2460_v23 = vld [vmem:[%s2607_s7 + $0xc] sm:$0xf0] }
  0x39   : > { %1294 = vmatpush.bf16.msrb.mxu2 %v2468_v37  ;;  %v2076_v37 = vor.u32 %v2440_v26, %v2075_v25  ;;  %v2212_v26 = vor.u32 %v2460_v23, %v2211_v22  ;;  %v2121_v31 = vld [vmem:[%s2607_s7 + $0x90] sm:$0xf]  ;;  %v2123_v32 = vld [vmem:[%s2607_s7 + $0x98] sm:$0xf] }
  0x3a   : > { %1429 = vmatpush.bf16.msrb.mxu3 %v2480_v7  ;;  %v538_v42 = vor.u32 %v537_v30, %v534_v29  ;;  %v553_v52 = vrot.slane %v552_v45, 4  ;;  %v2284_v29 = vor.u32 %v2472_v28, %v2283_v27  ;;  %v2484_v30 = vld [vmem:[%s3010_s1 + $0x200] sm:$0xff]  ;;  %v964_v35 = vshrl.u32 %v2121_v31, 16  ;;  %v2399_v45 = vld [vmem:[%s2607_s7 + $0x34] sm:$0xf0] }
  0x3b   : > { %321 = vmatmul.bf16.gmra.mxu1 %v1848_v53  ;;  %311 = vmatmul.bf16.gmra.mxu0 %v1840_v54  ;;  %v557_v53 = vrot.slane %v555_v46, 5  ;;  %v2464_v54 = vld [vmem:[%s3010_s1 + $0x180] sm:$0xff]  ;;  %v2087_v46 = vld [vmem:[%s2607_s7 + $0x108] sm:$0xf] }
  0x3c   : > { %403 = vmatpush.bf16.msrb.mxu1 %v2403_v47  ;;  %914 = vmatpush.bf16.msrb.mxu0 %v2447_v50  ;;  %v2457_v47 = vld [vmem:[%s3010_s1 + $0x168] sm:$0xff]  ;;  %v539_v50 = vrot.slane %v538_v42, 4  ;;  %v1494_v42 = vshrl.u32 %v2331_v34, 16 }
  0x3d   : > { %1295 = vmatpush.bf16.msrb.mxu2 %v2467_v1  ;;  %788 = vmatmul.bf16.gmra.mxu3 %v2008_v0  ;;  %v558_v61 = vsel %vm2641_vm2, %v553_v52, %v557_v53  ;;  %v2397_v0 = vld [vmem:[%s2607_s7 + $0x14] sm:$0xf0]  ;;  %v2079_v1 = vld [vmem:[%s2607_s7 + $0xe8] sm:$0xf] }
  0x3e   : > { %653 = vmatmul.bf16.gmra.mxu2 %v585_v55  ;;  %1430 = vmatpush.bf16.msrb.mxu3 %v2479_v14  ;;  %v2478_v55 = vld [vmem:[%s3010_s1 + $0x1d0] sm:$0xff]  ;;  %v544_v60 = vsel %vm2641_vm2, %v539_v50, %v543_v51  ;;  %v583_v4 = vunpack.c.l.b16 %v558_v61  ;;  %v2487_v14 = vld [vmem:[%s3010_s1 + $0x218] sm:$0xff]  ;;  %v966_v51 = vrot.slane %v964_v35, 4 }
  0x3f   : > { %v582_v3 = vunpack.c.l.b16 %v544_v60  ;;  %v2124_v50 = vld [vmem:[%s2607_s7 + $0x9c] sm:$0x1]  ;;  %v2330_v60 = vld [vmem:[%s2607_s7 + $0xc] sm:$0x1]  ;;  %v2332_v61 = vld [vmem:[%s2607_s7 + $0x14] sm:$0x1] }
  0x40   : > { %404 = vmatpush.bf16.msrb.mxu1 %v2402_v59  ;;  %915 = vmatpush.bf16.msrb.mxu0 %v2446_v63  ;;  %v2488_v59 = vld [vmem:[%s3010_s1 + $0x220] sm:$0xff]  ;;  %v1887_v63 = vld [vmem:[%s2607_s7 + $0x10] sm:$0xf] }
  0x41   : > { %1296 = vmatpush.bf16.msrb.mxu2 %v2466_v11  ;;  %v1888_v6 = vor.u32 %v2397_v0, %v1887_v63  ;;  %v587_v8 = vpack.c.b16 %v583_v4, %v582_v3  ;;  %v987_v0 = vshll.u32 %v2124_v50, 16 }
  0x42   : > { %1431 = vmatpush.bf16.msrb.mxu3 %v2478_v55  ;;  %v2461_v55 = vld [vmem:[%s2607_s7 + $0x1c] sm:$0xf0] }
  0x44   : > { %405 = vmatpush.bf16.msrb.mxu1 %v2401_v2  ;;  %916 = vmatpush.bf16.msrb.mxu0 %v2445_v9  ;;  %v2441_v2 = vld [vmem:[%s2607_s7 + $0xec] sm:$0xf0]  ;;  %v2015_v9 = vld [vmem:[%s2607_s7 + $0xc0] sm:$0xf] }
  0x45   : > { %1297 = vmatpush.bf16.msrb.mxu2 %v2465_v48  ;;  %v2080_v7 = vor.u32 %v2441_v2, %v2079_v1  ;;  %v2016_v11 = vor.u32 %v2431_v10, %v2015_v9  ;;  %v2215_v48 = vld [vmem:[%s2607_s7 + $0x18] sm:$0xf]  ;;  %v1503_v10 = vshll.u32 %v2332_v61, 16 }
  0x46   : > { %1432 = vmatpush.bf16.msrb.mxu3 %v2477_v58  ;;  %v1496_v58 = vrot.slane %v1494_v42, 4  ;;  %v2216_v2 = vor.u32 %v2461_v55, %v2215_v48  ;;  %v2128_v42 = vld [vmem:[%s2607_s7 + $0xac] sm:$0x1] }
  0x47   : > { %v1505_v23 = vrot.slane %v1503_v10, 5 }
  0x48   : > { %406 = vmatpush.bf16.msrb.mxu1 %v2400_v15  ;;  %917 = vmatpush.bf16.msrb.mxu0 %v2444_v21  ;;  %v2452_v15 = vld [vmem:[%s3010_s1 + $0x140] sm:$0xff] }
  0x49   : > { %1298 = vmatpush.bf16.msrb.mxu2 %v2464_v54  ;;  %v2442_v21 = vld [vmem:[%s2607_s7 + $0xfc] sm:$0xf0] }
  0x4a   : > { %1433 = vmatpush.bf16.msrb.mxu3 %v2476_v13  ;;  %v2125_v13 = vld [vmem:[%s2607_s7 + $0xa0] sm:$0xf] }
  0x4b   : > { %407 = vmatmul.bf16.vlgmr.msrb.gmra.mxu1 %v1884_v36  ;;  %918 = vmatmul.bf16.vlgmr.msrb.gmra.mxu0 %v2076_v37  ;;  %v967_v36 = vshll.u32 %v2121_v31, 16  ;;  %v978_v37 = vshrl.u32 %v2123_v32, 16 }
  0x4c   : > { %1156 = vmatpush.bf16.msra.mxu1 %v2459_v20  ;;  %1672 = vmatpush.bf16.msra.mxu0 %v2491_v24  ;;  %v2083_v20 = vld [vmem:[%s2607_s7 + $0xf8] sm:$0xf] }
  0x4d   : > { %793 = vmatmul.bf16.gmra.mxu3 %v2012_v49  ;;  %2523 = vmatpush.bf16.msra.mxu2 %v2491_v24  ;;  %v1892_v24 = vor.u32 %v2398_v19, %v1891_v17  ;;  %v2084_v25 = vor.u32 %v2442_v21, %v2083_v20  ;;  %v2122_v49 = vld [vmem:[%s2607_s7 + $0x94] sm:$0x1]  ;;  %v969_v52 = vrot.slane %v967_v36, 5  ;;  %v980_v53 = vrot.slane %v978_v37, 4  ;;  %v2335_v19 = vld [vmem:[%s2607_s7 + $0x20] sm:$0xf] }
  0x4e   : > { %658 = vmatmul.bf16.gmra.mxu2 %v586_v39  ;;  %v981_v39 = vshll.u32 %v2123_v32, 16  ;;  %v973_v63 = vshll.u32 %v2122_v49, 16  ;;  %v1525_v31 = vshll.u32 %v2335_v19, 16  ;;  %v2126_v36 = vld [vmem:[%s2607_s7 + $0xa4] sm:$0x1] }
  0x4f   : > { %v970_v3 = vor.u32 %v969_v52, %v966_v51  ;;  %v2334_v51 = vld [vmem:[%s2607_s7 + $0x1c] sm:$0x1]  ;;  %v2336_v52 = vld [vmem:[%s2607_s7 + $0x24] sm:$0x1] }
  0x50   : > { %1157 = vmatpush.bf16.msra.mxu1 %v2458_v33  ;;  %1673 = vmatpush.bf16.msra.mxu0 %v2490_v43  ;;  %v2329_v33 = vld [vmem:[%s2607_s7 + $0x8] sm:$0xf]  ;;  %v983_v54 = vrot.slane %v981_v39, 5 }
  0x51   : > { %2524 = vmatpush.bf16.msra.mxu2 %v2490_v43  ;;  %v1480_v40 = vshrl.u32 %v2329_v33, 16  ;;  %v1483_v41 = vshll.u32 %v2329_v33, 16  ;;  %v1497_v43 = vshll.u32 %v2331_v34, 16 }
  0x52   : > { %v984_v4 = vor.u32 %v983_v54, %v980_v53  ;;  %v2219_v53 = vld [vmem:[%s2607_s7 + $0x28] sm:$0xf]  ;;  %v2462_v54 = vld [vmem:[%s2607_s7 + $0x2c] sm:$0xf0] }
  0x54   : > { %1158 = vmatpush.bf16.msra.mxu1 %v2457_v47  ;;  %1674 = vmatpush.bf16.msra.mxu0 %v2489_v56  ;;  %v2443_v47 = vld [vmem:[%s2607_s7 + $0x10c] sm:$0xf0] }
  0x55   : > { %2525 = vmatpush.bf16.msra.mxu2 %v2489_v56  ;;  %v1482_v56 = vrot.slane %v1480_v40, 4  ;;  %v2088_v1 = vor.u32 %v2443_v47, %v2087_v46  ;;  %v1527_v46 = vrot.slane %v1525_v31, 5 }
  0x58   : > { %1159 = vmatpush.bf16.msra.mxu1 %v2456_v57  ;;  %1675 = vmatpush.bf16.msra.mxu0 %v2488_v59  ;;  %v1485_v57 = vrot.slane %v1483_v41, 5 }
  0x59   : > { %2526 = vmatpush.bf16.msra.mxu2 %v2488_v59  ;;  %v1499_v59 = vrot.slane %v1497_v43, 5 }
  0x5b   : > { %412 = vmatmul.bf16.gmra.mxu1 %v1888_v6  ;;  %923 = vmatmul.bf16.gmra.mxu0 %v2080_v7  ;;  %v2473_v6 = vld [vmem:[%s2607_s7 + $0x64] sm:$0xf0]  ;;  %v1486_v7 = vor.u32 %v1485_v57, %v1482_v56  ;;  %v1500_v9 = vor.u32 %v1499_v59, %v1496_v58  ;;  %v1001_v56 = vshll.u32 %v2126_v36, 16  ;;  %v1015_v58 = vshll.u32 %v2128_v42, 16  ;;  %v2130_v42 = vld [vmem:[%s2607_s7 + $0xb4] sm:$0x1] }
  0x5c   : > { %1160 = vmatpush.bf16.msra.mxu1 %v2455_v62  ;;  %1676 = vmatpush.bf16.msra.mxu0 %v2487_v14  ;;  %v1896_v62 = vor.u32 %v2399_v45, %v1895_v44 }
  0x5d   : > { %798 = vmatmul.bf16.gmra.mxu3 %v2016_v11  ;;  %2527 = vmatpush.bf16.msra.mxu2 %v2487_v14  ;;  %v975_v11 = vrot.slane %v973_v63, 5  ;;  %v2127_v14 = vld [vmem:[%s2607_s7 + $0xa8] sm:$0xf]  ;;  %v1487_v20 = vrot.slane %v1486_v7, 4  ;;  %v1501_v22 = vrot.slane %v1500_v9, 4  ;;  %v1017_v7 = vrot.slane %v1015_v58, 5 }
  0x5e   : > { %663 = vmatmul.bf16.gmra.mxu2 %v587_v8  ;;  %v1489_v8 = vshll.u32 %v2330_v60, 16  ;;  %v1009_v27 = vshll.u32 %v2127_v14, 16  ;;  %v1517_v60 = vshll.u32 %v2334_v51, 16  ;;  %v2223_v51 = vld [vmem:[%s2607_s7 + $0x38] sm:$0xf] }
  0x5f   : > { %v1506_v35 = vsel %vm2641_vm2, %v1501_v22, %v1505_v23  ;;  %v2342_v58 = vld [vmem:[%s2607_s7 + $0x3c] sm:$0x1] }
  0x60   : > { %1161 = vmatpush.bf16.msra.mxu1 %v2454_v5  ;;  %1677 = vmatpush.bf16.msra.mxu0 %v2486_v16  ;;  %v2287_v5 = vld [vmem:[%s2607_s7 + $0x60] sm:$0xf]  ;;  %v1491_v21 = vrot.slane %v1489_v8, 5  ;;  %v1011_v41 = vrot.slane %v1009_v27, 5  ;;  %v1609_v50 = vunpack.c.l.b16 %v1506_v35  ;;  %v1519_v9 = vrot.slane %v1517_v60, 5 }
  0x61   : > { %2528 = vmatpush.bf16.msra.mxu2 %v2486_v16  ;;  %v985_v16 = vrot.slane %v984_v4, 4  ;;  %v2288_v17 = vor.u32 %v2473_v6, %v2287_v5  ;;  %v1003_v5 = vrot.slane %v1001_v56, 5  ;;  %v2463_v56 = vld [vmem:[%s2607_s7 + $0x3c] sm:$0xf0] }
  0x62   : > { %v1492_v34 = vsel %vm2641_vm2, %v1487_v20, %v1491_v21  ;;  %v2341_v21 = vld [vmem:[%s2607_s7 + $0x38] sm:$0xf] }
  0x63   : > { %v1608_v49 = vunpack.c.l.b16 %v1492_v34  ;;  %v1567_v34 = vshll.u32 %v2341_v21, 16 }
  0x64   : > { %1162 = vmatpush.bf16.msra.mxu1 %v2453_v12  ;;  %1678 = vmatpush.bf16.msra.mxu0 %v2485_v18  ;;  %v989_v12 = vrot.slane %v987_v0, 5 }
  0x65   : > { %2529 = vmatpush.bf16.msra.mxu2 %v2485_v18  ;;  %v2333_v18 = vld [vmem:[%s2607_s7 + $0x18] sm:$0xf]  ;;  %v1616_v0 = vpack.c.b16 %v1609_v50, %v1608_v49 }
  0x66   : > { %v1508_v28 = vshrl.u32 %v2333_v18, 16  ;;  %v990_v33 = vsel %vm2641_vm2, %v985_v16, %v989_v12  ;;  %v2129_v12 = vld [vmem:[%s2607_s7 + $0xb0] sm:$0xf] }
  0x67   : > { %v1093_v48 = vunpack.c.l.b16 %v990_v33  ;;  %v2339_v16 = vld [vmem:[%s2607_s7 + $0x30] sm:$0xf]  ;;  %v1023_v20 = vshll.u32 %v2129_v12, 16  ;;  %v1564_v33 = vshrl.u32 %v2341_v21, 16 }
  0x68   : > { %1163 = vmatpush.bf16.msra.mxu1 %v2452_v15  ;;  %1679 = vmatpush.bf16.msra.mxu0 %v2484_v30  ;;  %v971_v15 = vrot.slane %v970_v3, 4  ;;  %v1510_v43 = vrot.slane %v1508_v28, 4  ;;  %v2474_v3 = vld [vmem:[%s2607_s7 + $0x74] sm:$0xf0] }
  0x69   : > { %2530 = vmatpush.bf16.msra.mxu2 %v2484_v30  ;;  %v1522_v30 = vshrl.u32 %v2335_v19, 16  ;;  %v1020_v19 = vshrl.u32 %v2129_v12, 16  ;;  %v1025_v36 = vrot.slane %v1023_v20, 5 }
  0x6a   : > { %v976_v32 = vsel %vm2641_vm2, %v971_v15, %v975_v11  ;;  %v2337_v15 = vld [vmem:[%s2607_s7 + $0x28] sm:$0xf] }
  0x6b   : > { %417 = vmatmul.bf16.gmra.mxu1 %v1892_v24  ;;  %928 = vmatmul.bf16.gmra.mxu0 %v2084_v25  ;;  %v992_v24 = vshrl.u32 %v2125_v13, 16  ;;  %v995_v25 = vshll.u32 %v2125_v13, 16  ;;  %v1524_v45 = vrot.slane %v1522_v30, 4  ;;  %v1092_v47 = vunpack.c.l.b16 %v976_v32 }
  0x6c   : > { %v1536_v27 = vshrl.u32 %v2337_v15, 16  ;;  %v1539_v28 = vshll.u32 %v2337_v15, 16  ;;  %v1553_v30 = vshll.u32 %v2339_v16, 16  ;;  %v1022_v35 = vrot.slane %v1020_v19, 4 }
  0x6d   : > { %1434 = vmatmul.bf16.vlgmr.msrb.gmra.mxu3 %v2284_v29  ;;  %v1511_v29 = vshll.u32 %v2333_v18, 16  ;;  %v994_v37 = vrot.slane %v992_v24, 4  ;;  %v997_v39 = vrot.slane %v995_v25, 5  ;;  %v1528_v61 = vor.u32 %v1527_v46, %v1524_v45  ;;  %v2338_v46 = vld [vmem:[%s2607_s7 + $0x2c] sm:$0x1] }
  0x6e   : > { %1299 = vmatmul.bf16.vlgmr.msrb.gmra.mxu2 %v2212_v26  ;;  %v1006_v26 = vshrl.u32 %v2127_v14, 16  ;;  %v1100_v63 = vpack.c.b16 %v1093_v48, %v1092_v47  ;;  %v2131_v14 = vld [vmem:[%s2607_s7 + $0xb8] sm:$0xf]  ;;  %v1538_v47 = vrot.slane %v1536_v27, 4  ;;  %v1541_v48 = vrot.slane %v1539_v28, 5 }
  0x6f   : > { %v1513_v44 = vrot.slane %v1511_v29, 5  ;;  %v998_v55 = vor.u32 %v997_v39, %v994_v37  ;;  %v1529_v10 = vrot.slane %v1528_v61, 4  ;;  %v1034_v24 = vshrl.u32 %v2131_v14, 16  ;;  %v2135_v27 = vld [vmem:[%s2607_s7 + $0xc8] sm:$0xf] }
  0x70   : > { %v1008_v40 = vrot.slane %v1006_v26, 4  ;;  %v1037_v25 = vshll.u32 %v2131_v14, 16  ;;  %v2343_v26 = vld [vmem:[%s2607_s7 + $0x40] sm:$0xf]  ;;  %v1550_v29 = vshrl.u32 %v2339_v16, 16  ;;  %v1555_v50 = vrot.slane %v1553_v30, 5 }
  0x71   : > { %v1514_v59 = vor.u32 %v1513_v44, %v1510_v43  ;;  %v999_v4 = vrot.slane %v998_v55, 4  ;;  %v1578_v37 = vshrl.u32 %v2343_v26, 16  ;;  %v1581_v39 = vshll.u32 %v2343_v26, 16  ;;  %v2132_v43 = vld [vmem:[%s2607_s7 + $0xbc] sm:$0x1] }
  0x72   : > { %v1012_v57 = vor.u32 %v1011_v41, %v1008_v40  ;;  %v1036_v44 = vrot.slane %v1034_v24, 4  ;;  %v1039_v45 = vrot.slane %v1037_v25, 5  ;;  %v1552_v49 = vrot.slane %v1550_v29, 4  ;;  %v2133_v24 = vld [vmem:[%s2607_s7 + $0xc0] sm:$0xf] }
  0x73   : > { %v1515_v8 = vrot.slane %v1514_v59, 4  ;;  %v1580_v59 = vrot.slane %v1578_v37, 4  ;;  %v1583_v60 = vrot.slane %v1581_v39, 5  ;;  %v1029_v61 = vshll.u32 %v2130_v42, 16 }
  0x74   : > { %v1013_v6 = vrot.slane %v1012_v57, 4  ;;  %v1026_v57 = vor.u32 %v1025_v36, %v1022_v35  ;;  %v1062_v35 = vshrl.u32 %v2135_v27, 16  ;;  %v1065_v36 = vshll.u32 %v2135_v27, 16 }
  0x75   : > { %v1520_v22 = vsel %vm2641_vm2, %v1515_v8, %v1519_v9  ;;  %v2475_v8 = vld [vmem:[%s2607_s7 + $0x84] sm:$0xf0]  ;;  %v1584_v12 = vor.u32 %v1583_v60, %v1580_v59  ;;  %v1031_v14 = vrot.slane %v1029_v61, 5 }
  0x76   : > { %v1018_v18 = vsel %vm2641_vm2, %v1013_v6, %v1017_v7  ;;  %v1610_v40 = vunpack.c.l.b16 %v1520_v22  ;;  %v2224_v6 = vor.u32 %v2463_v56, %v2223_v51  ;;  %v2295_v7 = vld [vmem:[%s2607_s7 + $0x80] sm:$0xf] }
  0x77   : > { %v1095_v32 = vunpack.c.l.b16 %v1018_v18  ;;  %v2296_v18 = vor.u32 %v2475_v8, %v2295_v7  ;;  %v1585_v25 = vrot.slane %v1584_v12, 4 }
  0x7b   : > { %422 = vmatmul.bf16.gmra.mxu1 %v1896_v62  ;;  %933 = vmatmul.bf16.gmra.mxu0 %v2088_v1  ;;  %v1531_v62 = vshll.u32 %v2336_v52, 16  ;;  %v2220_v1 = vor.u32 %v2462_v54, %v2219_v53  ;;  %v2340_v52 = vld [vmem:[%s2607_s7 + $0x34] sm:$0x1]  ;;  %v1566_v53 = vrot.slane %v1564_v33, 4  ;;  %v1569_v54 = vrot.slane %v1567_v34, 5 }
  0x7c   : > { %v1051_v34 = vshll.u32 %v2133_v24, 16 }
  0x7d   : > { %1439 = vmatmul.bf16.gmra.mxu3 %v2288_v17  ;;  %v1533_v11 = vrot.slane %v1531_v62, 5  ;;  %v1004_v17 = vsel %vm2641_vm2, %v999_v4, %v1003_v5  ;;  %v1040_v62 = vor.u32 %v1039_v45, %v1036_v44  ;;  %v1556_v4 = vor.u32 %v1555_v50, %v1552_v49  ;;  %v2136_v50 = vld [vmem:[%s2607_s7 + $0xcc] sm:$0x1] }
  0x7e   : > { %1304 = vmatmul.bf16.gmra.mxu2 %v2216_v2  ;;  %v2291_v2 = vld [vmem:[%s2607_s7 + $0x70] sm:$0xf]  ;;  %v1094_v31 = vunpack.c.l.b16 %v1004_v17  ;;  %v1559_v5 = vshll.u32 %v2340_v52, 16  ;;  %v1570_v9 = vor.u32 %v1569_v54, %v1566_v53  ;;  %v1067_v49 = vrot.slane %v1065_v36, 5 }
  0x7f   : > { %v2292_v13 = vor.u32 %v2474_v3, %v2291_v2  ;;  %v1534_v23 = vsel %vm2641_vm2, %v1529_v10, %v1533_v11  ;;  %v1542_v3 = vor.u32 %v1541_v48, %v1538_v47  ;;  %v1573_v10 = vshll.u32 %v2342_v58, 16 }
  0x80   : > { %v1611_v41 = vunpack.c.l.b16 %v1534_v23  ;;  %v1101_v55 = vpack.c.b16 %v1095_v32, %v1094_v31  ;;  %v1027_v11 = vrot.slane %v1026_v57, 4  ;;  %v1041_v15 = vrot.slane %v1040_v62, 4 }
  0x81   : > { %v1543_v19 = vrot.slane %v1542_v3, 4  ;;  %v1557_v20 = vrot.slane %v1556_v4, 4  ;;  %v1561_v21 = vrot.slane %v1559_v5, 5  ;;  %v1571_v22 = vrot.slane %v1570_v9, 4 }
  0x82   : > { %v1617_v2 = vpack.c.b16 %v1611_v41, %v1610_v40  ;;  %v1575_v23 = vrot.slane %v1573_v10, 5  ;;  %v1032_v28 = vsel %vm2641_vm2, %v1027_v11, %v1031_v14  ;;  %v1048_v32 = vshrl.u32 %v2133_v24, 16 }
  0x83   : > { %v1562_v31 = vsel %vm2641_vm2, %v1557_v20, %v1561_v21  ;;  %v1096_v39 = vunpack.c.l.b16 %v1032_v28  ;;  %v1053_v47 = vrot.slane %v1051_v34, 5  ;;  %v1064_v48 = vrot.slane %v1062_v35, 4 }
  0x84   : > { %v1576_v33 = vsel %vm2641_vm2, %v1571_v22, %v1575_v23  ;;  %v1613_v42 = vunpack.c.l.b16 %v1562_v31  ;;  %v1050_v44 = vrot.slane %v1048_v32, 4  ;;  %v1071_v59 = vshll.u32 %v2136_v50, 16 }
  0x85   : > { %v1068_v58 = vor.u32 %v1067_v49, %v1064_v48 }
  0x86   : > { %v1054_v57 = vor.u32 %v1053_v47, %v1050_v44 }
  0x87   : > { %v1069_v62 = vrot.slane %v1068_v58, 4 }
  0x88   : > { %v1055_v60 = vrot.slane %v1054_v57, 4 }
  0x8b   : > { %1164 = vmatmul.bf16.vlgmr.msra.gmra.mxu1 %v1100_v63  ;;  %1680 = vmatmul.bf16.vlgmr.msra.gmra.mxu0 %v1616_v0  ;;  %v1043_v63 = vshll.u32 %v2132_v43, 16  ;;  %v1545_v0 = vshll.u32 %v2338_v46, 16  ;;  %v1614_v43 = vunpack.c.l.b16 %v1576_v33  ;;  %v2134_v46 = vld [vmem:[%s2607_s7 + $0xc4] sm:$0x1] }
  0x8c   : > { %v1057_v53 = vshll.u32 %v2134_v46, 16 }
  0x8d   : > { %1444 = vmatmul.bf16.gmra.mxu3 %v2292_v13  ;;  %v1045_v16 = vrot.slane %v1043_v63, 5  ;;  %v1547_v17 = vrot.slane %v1545_v0, 5  ;;  %v1073_v63 = vrot.slane %v1071_v59, 5 }
  0x8e   : > { %1309 = vmatmul.bf16.gmra.mxu2 %v2220_v1  ;;  %v2344_v1 = vld [vmem:[%s2607_s7 + $0x44] sm:$0x1]  ;;  %v1059_v61 = vrot.slane %v1057_v53, 5 }
  0x8f   : > { %v1587_v13 = vshll.u32 %v2344_v1, 16  ;;  %v1046_v29 = vsel %vm2641_vm2, %v1041_v15, %v1045_v16  ;;  %v1548_v30 = vsel %vm2641_vm2, %v1543_v19, %v1547_v17  ;;  %v1074_v4 = vsel %vm2641_vm2, %v1069_v62, %v1073_v63 }
  0x90   : > { %v1097_v40 = vunpack.c.l.b16 %v1046_v29  ;;  %v1612_v41 = vunpack.c.l.b16 %v1548_v30  ;;  %v1060_v3 = vsel %vm2641_vm2, %v1055_v60, %v1059_v61  ;;  %v1099_v7 = vunpack.c.l.b16 %v1074_v4 }
  0x91   : > { %v1589_v26 = vrot.slane %v1587_v13, 5 }
  0x92   : > { %v1102_v51 = vpack.c.b16 %v1097_v40, %v1096_v39  ;;  %v1618_v52 = vpack.c.b16 %v1613_v42, %v1612_v41 }
  0x93   : > { %v1590_v37 = vsel %vm2641_vm2, %v1585_v25, %v1589_v26 }
  0x94   : > { %v1615_v45 = vunpack.c.l.b16 %v1590_v37 }
  0x96   : > { %v1619_v56 = vpack.c.b16 %v1615_v45, %v1614_v43 }
  0x9b   : > { %1169 = vmatmul.bf16.gmra.mxu1 %v1101_v55  ;;  %1685 = vmatmul.bf16.gmra.mxu0 %v1617_v2 }
  0x9d   : > { %1449 = vmatmul.bf16.gmra.mxu3 %v2296_v18 }
  0x9e   : > { %1314 = vmatmul.bf16.gmra.mxu2 %v2224_v6  ;;  %v1098_v6 = vunpack.c.l.b16 %v1060_v3 }
  0xa0   : > { %v1103_v8 = vpack.c.b16 %v1099_v7, %v1098_v6 }
  0xa8   : > { %v317_v54 = vpop.f32.mrf.mxu1  ;;  %v307_v55 = vpop.f32.mrf.mxu0 }
  0xab   : > { %1174 = vmatmul.bf16.gmra.mxu1 %v1102_v51  ;;  %1690 = vmatmul.bf16.gmra.mxu0 %v1618_v52 }
  0xae   : > { %1695 = vmatmul.bf16.vlgmr.msra.gmra.mxu2 %v1619_v56 }
  0xb0   : > { %v319_v1 = vpop.f32.mrf.mxu1  ;;  %v309_v2 = vpop.f32.mrf.mxu0 }
  0xb1   : > { %v649_v0 = vpop.f32.mrf.mxu2  ;;  %v784_v5 = vpop.f32.mrf.mxu3 }
  0xb8   : > { %v322_v10 = vpop.f32.mrf.mxu1  ;;  %v312_v11 = vpop.f32.mrf.mxu0 }
  0xb9   : > { %v651_v9 = vpop.f32.mrf.mxu2  ;;  %v2949_v12 = vpop.f32.mrf.mxu3 }
  0xbb   : > { %1179 = vmatmul.bf16.gmra.mxu1 %v1103_v8 }
  0xc0   : > { %v324_v14 = vpop.f32.mrf.mxu1  ;;  %v314_v15 = vpop.f32.mrf.mxu0 }
  0xc1   : > { %v654_v13 = vpop.f32.mrf.mxu2  ;;  %v789_v16 = vpop.f32.mrf.mxu3 }
  0xc8   : > { %v408_v18 = vpop.f32.mrf.mxu1  ;;  %v919_v19 = vpop.f32.mrf.mxu0 }
  0xc9   : > { %v656_v17 = vpop.f32.mrf.mxu2  ;;  %v409_v20 = vadd.f32 %v408_v18, %v307_v55  ;;  %v2951_v21 = vpop.f32.mrf.mxu3 }
  0xcb   : > { %v669_v38 = vadd.f32 %v649_v0, %v409_v20 }
  0xcd   : > { %v804_v22 = vadd.f32 %v784_v5, %v669_v38 }
  0xcf   : > { %v939_v23 = vadd.f32 %v919_v19, %v804_v22 }
  0xd0   : > { %v410_v25 = vpop.f32.mrf.mxu1  ;;  %v921_v26 = vpop.f32.mrf.mxu0 }
  0xd1   : > { %v659_v24 = vpop.f32.mrf.mxu2  ;;  %v411_v27 = vadd.f32 %v410_v25, %v309_v2  ;;  %v794_v29 = vpop.f32.mrf.mxu3 }
  0xd3   : > { %v670_v28 = vadd.f32 %v651_v9, %v411_v27 }
  0xd8   : > { %v413_v31 = vpop.f32.mrf.mxu1  ;;  %v924_v32 = vpop.f32.mrf.mxu0 }
  0xd9   : > { %v661_v30 = vpop.f32.mrf.mxu2  ;;  %v414_v33 = vadd.f32 %v413_v31, %v312_v11  ;;  %v2953_v39 = vpop.f32.mrf.mxu3 }
  0xdb   : > { %v671_v34 = vadd.f32 %v654_v13, %v414_v33 }
  0xdd   : > { %v806_v35 = vadd.f32 %v789_v16, %v671_v34 }
  0xdf   : > { %v941_v36 = vadd.f32 %v924_v32, %v806_v35 }
  0xe0   : > { %v415_v40 = vpop.f32.mrf.mxu1  ;;  %v2955_v41 = vpop.f32.mrf.mxu0 }
  0xe1   : > { %v664_v37 = vpop.f32.mrf.mxu2  ;;  %v416_v42 = vadd.f32 %v415_v40, %v314_v15  ;;  %v799_v48 = vpop.f32.mrf.mxu3 }
  0xe3   : > { %v672_v43 = vadd.f32 %v656_v17, %v416_v42 }
  0xe5   : > { %v807_v31 = vadd.f32 %v2951_v21, %v672_v43 }
  0xe7   : > { %v942_v42 = vadd.f32 %v2955_v41, %v807_v31 }
  0xe8   : > { %v418_v45 = vpop.f32.mrf.mxu1  ;;  %v929_v46 = vpop.f32.mrf.mxu0 }
  0xe9   : > { %v666_v44 = vpop.f32.mrf.mxu2  ;;  %v419_v47 = vadd.f32 %v418_v45, %v317_v54  ;;  %v2963_v58 = vpop.f32.mrf.mxu3 }
  0xeb   : > { %v673_v49 = vadd.f32 %v659_v24, %v419_v47 }
  0xed   : > { %v808_v50 = vadd.f32 %v794_v29, %v673_v49 }
  0xef   : > { %v2957_v51 = vadd.f32 %v929_v46, %v808_v50 }
  0xf0   : > { %v420_v53 = vpop.f32.mrf.mxu1  ;;  %v2959_v55 = vpop.f32.mrf.mxu0 }
  0xf1   : > { %v1300_v52 = vpop.f32.mrf.mxu2  ;;  %v421_v56 = vadd.f32 %v420_v53, %v319_v1  ;;  %v1435_v0 = vpop.f32.mrf.mxu3 }
  0xf3   : > { %v2961_v57 = vadd.f32 %v661_v30, %v421_v56 }
  0xf8   : > { %v423_v60 = vpop.f32.mrf.mxu1  ;;  %v934_v61 = vpop.f32.mrf.mxu0 }
  0xf9   : > { %v1302_v59 = vpop.f32.mrf.mxu2  ;;  %v424_v62 = vadd.f32 %v423_v60, %v322_v10  ;;  %v1437_v7 = vpop.f32.mrf.mxu3  ;;  %v805_v10 = vadd.f32 %v2949_v12, %v670_v28  ;;  %v809_v60 = vadd.f32 %v2953_v39, %v2961_v57 }
  0xfb   : > { %v675_v63 = vadd.f32 %v664_v37, %v424_v62  ;;  %v940_v16 = vadd.f32 %v921_v26, %v805_v10 }
  0xfd   : > { %v810_v54 = vadd.f32 %v799_v48, %v675_v63 }
  0xff   : > { %v2965_v2 = vadd.f32 %v934_v61, %v810_v54 }
 0x100   : > { %v425_v4 = vpop.f32.mrf.mxu1  ;;  %v2967_v5 = vpop.f32.mrf.mxu0 }
 0x101   : > { %v1305_v3 = vpop.f32.mrf.mxu2  ;;  %v426_v6 = vadd.f32 %v425_v4, %v324_v14  ;;  %v1440_v38 = vpop.f32.mrf.mxu3  ;;  %v2976_v14 = vld [vmem:[%s3011_s2] ss:$0 sm:$0xff] }
 0x103   : > { %v2969_v1 = vadd.f32 %v666_v44, %v426_v6 }
 0x108   : > { %v1165_v8 = vpop.f32.mrf.mxu1  ;;  %v1681_v9 = vpop.f32.mrf.mxu0 }
 0x109   : > { %v1185_v11 = vadd.f32 %v1165_v8, %v939_v23  ;;  %v1307_v13 = vpop.f32.mrf.mxu2  ;;  %v1442_v35 = vpop.f32.mrf.mxu3 }
 0x10b   : > { %v1320_v15 = vadd.f32 %v1300_v52, %v1185_v11 }
 0x10d   : > { %v1455_v17 = vadd.f32 %v1435_v0, %v1320_v15  ;;  %v944_v0 = vadd.f32 %v2959_v55, %v809_v60 }
 0x10f   : > { %v1701_v22 = vadd.f32 %v1681_v9, %v1455_v17  ;;  %v811_v17 = vadd.f32 %v2963_v58, %v2969_v1 }
 0x110   : > { %v1167_v18 = vpop.f32.mrf.mxu1  ;;  %v1683_v19 = vpop.f32.mrf.mxu0 }
 0x111   : > { %v1186_v20 = vadd.f32 %v1167_v18, %v940_v16  ;;  %v1310_v25 = vpop.f32.mrf.mxu2  ;;  %v1713_v12 = vadd.f32 %v2976_v14, %v1701_v22  ;;  %v1445_v48 = vpop.f32.mrf.mxu3 }
 0x113   : > { %v1321_v24 = vadd.f32 %v1302_v59, %v1186_v20  ;;  %v1721_v32 = vmax.f32 %v1713_v12, 0.0 }
 0x115   : > { %v1456_v23 = vadd.f32 %v1437_v7, %v1321_v24  ;;  %v946_v24 = vadd.f32 %v2967_v5, %v811_v17 }
 0x117   : > { %v1702_v27 = vadd.f32 %v1683_v19, %v1456_v23 }
 0x118   : > { %v1170_v26 = vpop.f32.mrf.mxu1  ;;  %v1686_v28 = vpop.f32.mrf.mxu0 }
 0x119   : > { %v1714_v29 = vadd.f32 %v2976_v14, %v1702_v27  ;;  %v1187_v30 = vadd.f32 %v1170_v26, %v941_v36  ;;  %v1312_v40 = vpop.f32.mrf.mxu2  ;;  %v1447_v4 = vpop.f32.mrf.mxu3 }
 0x11b   : > { %v1722_v33 = vmax.f32 %v1714_v29, 0.0  ;;  %v1322_v34 = vadd.f32 %v1305_v3, %v1187_v30 }
 0x11d   : > { %v2495_v37 = vpack.c.bf16 %v1722_v33, %v1721_v32  ;;  %v1457_v44 = vadd.f32 %v1440_v38, %v1322_v34 }
 0x11f   : > { %2496 = vst [vmem:[%s2985_s22] sm:$0xff] %v2495_v37   ;;  %v1703_v21 = vadd.f32 %v1686_v28, %v1457_v44 }
 0x120   : > { %v1172_v45 = vpop.f32.mrf.mxu1  ;;  %v1688_v36 = vpop.f32.mrf.mxu0 }
 0x121   : > { %v1188_v46 = vadd.f32 %v1172_v45, %v942_v42  ;;  %v1715_v49 = vadd.f32 %v2976_v14, %v1703_v21  ;;  %v1315_v52 = vpop.f32.mrf.mxu2  ;;  %v1450_v55 = vpop.f32.mrf.mxu3 }
 0x123   : > { %v1323_v43 = vadd.f32 %v1307_v13, %v1188_v46  ;;  %v1723_v61 = vmax.f32 %v1715_v49, 0.0 }
 0x125   : > { %v1458_v47 = vadd.f32 %v1442_v35, %v1323_v43 }
 0x127   : > { %v1704_v50 = vadd.f32 %v1688_v36, %v1458_v47 }
 0x128   : > { %v1175_v53 = vpop.f32.mrf.mxu1  ;;  %v1691_v41 = vpop.f32.mrf.mxu0 }
 0x129   : > { %v1716_v56 = vadd.f32 %v2976_v14, %v1704_v50  ;;  %v1189_v59 = vadd.f32 %v1175_v53, %v2957_v51  ;;  %v1317_v8 = vpop.f32.mrf.mxu2  ;;  %v1452_v28 = vpop.f32.mrf.mxu3 }
 0x12b   : > { %v1724_v62 = vmax.f32 %v1716_v56, 0.0  ;;  %v1324_v63 = vadd.f32 %v1310_v25, %v1189_v59 }
 0x12d   : > { %v2500_v54 = vpack.c.bf16 %v1724_v62, %v1723_v61  ;;  %v1459_v3 = vadd.f32 %v1445_v48, %v1324_v63 }
 0x12f   : > { %2512 = vst [vmem:[%s2985_s22 + $0x8] sm:$0xff] %v2500_v54   ;;  %v1705_v9 = vadd.f32 %v1691_v41, %v1459_v3 }
 0x130   : > { %v1177_v6 = vpop.f32.mrf.mxu1  ;;  %v1693_v51 = vpop.f32.mrf.mxu0 }
 0x131   : > { %v1190_v7 = vadd.f32 %v1177_v6, %v944_v0  ;;  %v1717_v10 = vadd.f32 %v2976_v14, %v1705_v9  ;;  %v1696_v38 = vpop.f32.mrf.mxu2 }
 0x133   : > { %v1325_v11 = vadd.f32 %v1312_v40, %v1190_v7  ;;  %v1725_v18 = vmax.f32 %v1717_v10, 0.0 }
 0x135   : > { %v1460_v13 = vadd.f32 %v1447_v4, %v1325_v11 }
 0x137   : > { %v1706_v39 = vadd.f32 %v1693_v51, %v1460_v13 }
 0x138   : > { %v1180_v57 = vpop.f32.mrf.mxu1 }
 0x139   : > { %v1718_v15 = vadd.f32 %v2976_v14, %v1706_v39  ;;  %v1191_v16 = vadd.f32 %v1180_v57, %v2965_v2  ;;  %v1698_v29 = vpop.f32.mrf.mxu2 }
 0x13b   : > { %v1726_v19 = vmax.f32 %v1718_v15, 0.0  ;;  %v1326_v20 = vadd.f32 %v1315_v52, %v1191_v16 }
 0x13d   : > { %v2505_v22 = vpack.c.bf16 %v1726_v19, %v1725_v18  ;;  %v1461_v25 = vadd.f32 %v1450_v55, %v1326_v20 }
 0x13f   : > { %2513 = vst [vmem:[%s2985_s22 + $0x10] sm:$0xff] %v2505_v22   ;;  %v1707_v27 = vadd.f32 %v1696_v38, %v1461_v25 }
 0x140   : > { %v1182_v23 = vpop.f32.mrf.mxu1 }
 0x141   : > { %v1192_v12 = vadd.f32 %v1182_v23, %v946_v24  ;;  %v1719_v30 = vadd.f32 %v2976_v14, %v1707_v27 }
 0x143   : > { %v1327_v26 = vadd.f32 %v1317_v8, %v1192_v12  ;;  %v1727_v31 = vmax.f32 %v1719_v30, 0.0 }
 0x145   : > { %v1462_v2 = vadd.f32 %v1452_v28, %v1327_v26 }
 0x147   : > { %v1708_v58 = vadd.f32 %v1698_v29, %v1462_v2 }
 0x149   : > { %v1720_v1 = vadd.f32 %v2976_v14, %v1708_v58 }
 0x14b   : > { %v1728_v32 = vmax.f32 %v1720_v1, 0.0 }
 0x14d   : > { %v2510_v33 = vpack.c.bf16 %v1728_v32, %v1727_v31 }
 0x14f   : > { %2514 = vst [vmem:[%s2985_s22 + $0x18] sm:$0xff] %v2510_v33  }
 0x150 PF: > { %s13_s12 = sadd.s32 1, %s2547_s12  }
 0x151   : > { %p10_p5 = scmp.ge.s32.totalorder %s13_s12, 4  }
 0x153   :  { %12 = sbr.rel (!%p10_p5) target bundleno = 1 (0x1), region = 75 }

</bundles_post_ra>
